<compile_context>
chip_gen: v5e
topology: v5e:2x2
jax: 0.10.0
libtpu: 0.0.40
codegen_flags: <defaults>
</compile_context>

<pallas_src>
import jax
import jax.numpy as jnp
from jax.experimental import pallas as pl
from jax.experimental.pallas import tpu as pltpu

# ---- small, deterministic config (consistent with the module's shapes) ----
VOCAB = 50     # pretrain embedding vocab size
B = 2          # real batch
BP = 8         # batch padded to a full sublane tile
L = 8          # seq_length
E = 16         # embedding_dim
H = 32         # hidden_size
C = 5          # num_class
D = E + 2 * H  # FC input width (80)
SIG = 6 * H    # sigmoid-gate lane block (i,f,o for both directions) = 192
GW = 8 * H     # fused gate width (both directions) = 256
FC_PAD = 128   # lane-dense FC output width (sliced to C in the wrapper)


# --------------------------- Pallas kernel --------------------------------
def rcnn_kernel(xcomb_ref,                       # [L*BP, 2E]  row t*BP+b = [x(t) | x(L-1-t)]
                wih0_ref, b0_ref, whh0_ref,      # [2E,8H], [1,8H], [2H,8H] (block-diag)
                wA1_ref, wB1_ref, b1_ref, whh1_ref,  # [2H,8H] x3, [1,8H]
                pe_ref,                          # [BP, E]   tanh(max_t embed) (wrapper)
                fcw_ref, fcb_ref,                # [D, 128], [1, 128]  (zero padded)
                out_ref,                         # [BP, 128]
                h_buf, hr_buf):                  # VMEM scratch: [L*BP, 2H] each

    def step(gates, c):
        # Fused gate layout: [i_f,i_b,f_f,f_b,o_f,o_b,g_f,g_b] (each H lanes).
        # Sigmoid columns were pre-scaled by 0.5 in the wrapper, so one tanh
        # over all 8H lanes activates everything: sigmoid(z)=0.5*tanh(z/2)+0.5.
        th = jnp.tanh(gates)                       # 2 EUP pushes (256 lanes f32)
        sig = 0.5 * th[:, 0:SIG] + 0.5             # VPU only
        i = sig[:, 0:2 * H]
        f = sig[:, 2 * H:4 * H]
        o = sig[:, 4 * H:6 * H]
        g = th[:, SIG:GW]
        c_new = f * c + i * g                      # [BP, 2H] fused fwd|bwd
        h_new = o * jnp.tanh(c_new)                # 1 EUP push
        return h_new, c_new

    # ----- layer 0: one batched input projection for all steps & directions --
    xproj0 = jnp.dot(xcomb_ref[...], wih0_ref[...],
                     preferred_element_type=jnp.float32) + b0_ref[...]   # [L*BP, 8H]

    whh0 = whh0_ref[...]
    h = jnp.zeros((BP, 2 * H), jnp.float32)
    c = jnp.zeros((BP, 2 * H), jnp.float32)
    for t in range(L):
        # Row block t already holds fwd-gate contribution of time t and
        # bwd-gate contribution of time L-1-t (packed in the wrapper).
        gates = xproj0[t * BP:(t + 1) * BP, :] \
            + jnp.dot(h, whh0, preferred_element_type=jnp.float32)
        h, c = step(gates, c)
        # h = [h_f(t) | h_b(L-1-t)]; keep both time orders for layer 1.
        h_buf[t * BP:(t + 1) * BP, :] = h
        hr_buf[(L - 1 - t) * BP:(L - t) * BP, :] = h

    # ----- layer 1: batched input projection of the layer-0 outputs ----------
    # h_buf[s]  = [h_f(s)     | h_b(L-1-s)],  hr_buf[s] = [h_f(L-1-s) | h_b(s)]
    # wA1 / wB1 are masked so their sum reconstructs, per row block s, the fwd
    # gates of time s and the bwd gates of time L-1-s.
    xproj1 = (jnp.dot(h_buf[...], wA1_ref[...], preferred_element_type=jnp.float32)
              + jnp.dot(hr_buf[...], wB1_ref[...], preferred_element_type=jnp.float32)
              + b1_ref[...])                                             # [L*BP, 8H]

    whh1 = whh1_ref[...]
    h = jnp.zeros((BP, 2 * H), jnp.float32)
    c = jnp.zeros((BP, 2 * H), jnp.float32)
    pool = jnp.full((BP, 2 * H), -jnp.inf, jnp.float32)   # running max of raw h
    for t in range(L):
        gates = xproj1[t * BP:(t + 1) * BP, :] \
            + jnp.dot(h, whh1, preferred_element_type=jnp.float32)
        h, c = step(gates, c)
        pool = jnp.maximum(pool, h)

    # tanh once after the pool (tanh is monotonic -> max(tanh(x)) == tanh(max(x))).
    ph = jnp.tanh(pool)                                    # [BP, 2H] = [fwd | bwd]

    # ----- fully connected, lane-dense (8,128) unmasked output store ---------
    fcw = fcw_ref[...]
    out = (jnp.dot(pe_ref[...], fcw[0:E, :], preferred_element_type=jnp.float32)
           + jnp.dot(ph, fcw[E:E + 2 * H, :], preferred_element_type=jnp.float32)
           + fcb_ref[...])
    out_ref[...] = out.astype(out_ref.dtype)


# --------------------- wrapper-side weight preparation ----------------------
def _fuse_gate_cols(wf, wb):
    """[in,4H] fwd + [in,4H] bwd (PyTorch col order i,f,g,o) ->
    [in,8H] with fused col order [i_f,i_b,f_f,f_b,o_f,o_b,g_f,g_b]."""
    i_f, f_f, g_f, o_f = jnp.split(wf, 4, axis=1)
    i_b, f_b, g_b, o_b = jnp.split(wb, 4, axis=1)
    return jnp.concatenate([i_f, i_b, f_f, f_b, o_f, o_b, g_f, g_b], axis=1)


def _prescale_sig(w):
    """Scale the sigmoid-gate columns by 0.5 so a single in-kernel tanh
    activates everything (sigmoid(z) == 0.5*tanh(z/2)+0.5)."""
    return w.at[..., :SIG].multiply(0.5)


def build_kernel_params(p):
    zE = jnp.zeros((E, 4 * H), jnp.float32)
    zH = jnp.zeros((H, 4 * H), jnp.float32)

    # layer 0: stacked input weight ([x(t) | x(L-1-t)] -> fused gates) and
    # block-diagonal recurrent weight ([h_f | h_b] -> fused gates).
    wih0 = jnp.concatenate([_fuse_gate_cols(p['wih0f'], zE),
                            _fuse_gate_cols(zE, p['wih0b'])], axis=0)    # [2E, 8H]
    whh0 = jnp.concatenate([_fuse_gate_cols(p['whh0f'], zH),
                            _fuse_gate_cols(zH, p['whh0b'])], axis=0)    # [2H, 8H]
    b0 = _fuse_gate_cols(p['b0f'], p['b0b'])                             # [1, 8H]

    # layer 1: split/masked input weights for the two time orders of h0.
    #   h_buf[s]  = [h_f(s) | h_b(L-1-s)]  -> wA1
    #   hr_buf[s] = [h_f(L-1-s) | h_b(s)]  -> wB1
    wA1 = jnp.concatenate([_fuse_gate_cols(p['wih1f'][:H], zH),
                           _fuse_gate_cols(zH, p['wih1b'][H:])], axis=0)  # [2H, 8H]
    wB1 = jnp.concatenate([_fuse_gate_cols(zH, p['wih1b'][:H]),
                           _fuse_gate_cols(p['wih1f'][H:], zH)], axis=0)  # [2H, 8H]
    whh1 = jnp.concatenate([_fuse_gate_cols(p['whh1f'], zH),
                            _fuse_gate_cols(zH, p['whh1b'])], axis=0)     # [2H, 8H]
    b1 = _fuse_gate_cols(p['b1f'], p['b1b'])                              # [1, 8H]

    # FC: lane-dense, zero-padded to 128 output lanes.
    fcw = jnp.zeros((D, FC_PAD), jnp.float32).at[:, :C].set(p['fcw'])
    fcb = jnp.zeros((1, FC_PAD), jnp.float32).at[:, :C].set(p['fcb'])

    scaled = tuple(_prescale_sig(w) for w in (wih0, b0, whh0, wA1, wB1, b1, whh1))
    return scaled + (fcw, fcb)


# ------------------------------ wrapper ------------------------------------
def textrcnn_forward(x_ids, p):
    wih0, b0, whh0, wA1, wB1, b1, whh1, fcw, fcb = build_kernel_params(p)

    # Embedding gather, batch padding (2 -> 8 sublanes), and the embedding
    # max-pool stay in plain-JAX glue; the LSTM / pool / FC hot path runs in
    # the Pallas kernel.
    embed = jnp.take(p['emb'], x_ids, axis=0).astype(jnp.float32)        # [B, L, E]
    embed_p = jnp.zeros((BP, L, E), jnp.float32).at[:B].set(embed)       # [BP, L, E]
    e_t = jnp.transpose(embed_p, (1, 0, 2))                              # [L, BP, E]
    # Row block t of xcomb packs x(t) (fwd-direction input) and x(L-1-t)
    # (bwd-direction input) so the kernel slices one aligned block per step.
    xcomb = jnp.concatenate([e_t, e_t[::-1]], axis=-1).reshape(L * BP, 2 * E)
    pe = jnp.tanh(jnp.max(embed_p, axis=1))                              # [BP, E]

    args = (xcomb, wih0, b0, whh0, wA1, wB1, b1, whh1, pe, fcw, fcb)
    in_specs = [pl.BlockSpec(memory_space=pltpu.MemorySpace.VMEM) for _ in args]
    out = pl.pallas_call(
        rcnn_kernel,
        out_shape=jax.ShapeDtypeStruct((BP, FC_PAD), jnp.float32),
        in_specs=in_specs,
        out_specs=pl.BlockSpec(memory_space=pltpu.MemorySpace.VMEM),
        scratch_shapes=[pltpu.VMEM((L * BP, 2 * H), jnp.float32),
                        pltpu.VMEM((L * BP, 2 * H), jnp.float32)],
    )(*args)
    return out[:B, :C]


# ------------------------ deterministic parameters --------------------------
def init_params(key):
    keys = jax.random.split(key, 20)
    bound = 1.0 / jnp.sqrt(jnp.float32(H))

    def u(k, shape):
        return jax.random.uniform(k, shape, jnp.float32, -bound, bound)

    p = {}
    p['emb'] = 0.1 * jax.random.normal(keys[0], (VOCAB, E), jnp.float32)
    # layer 0 (input E), forward / backward.  Weights stored transposed: [in, 4H],
    # column order [i, f, g, o] (PyTorch convention).
    p['wih0f'] = u(keys[1], (E, 4 * H));      p['whh0f'] = u(keys[2], (H, 4 * H))
    p['b0f'] = u(keys[3], (1, 4 * H)) + u(keys[4], (1, 4 * H))       # b_ih + b_hh
    p['wih0b'] = u(keys[5], (E, 4 * H));      p['whh0b'] = u(keys[6], (H, 4 * H))
    p['b0b'] = u(keys[7], (1, 4 * H)) + u(keys[8], (1, 4 * H))
    # layer 1 (input 2H), forward / backward.
    p['wih1f'] = u(keys[9], (2 * H, 4 * H));  p['whh1f'] = u(keys[10], (H, 4 * H))
    p['b1f'] = u(keys[11], (1, 4 * H)) + u(keys[12], (1, 4 * H))
    p['wih1b'] = u(keys[13], (2 * H, 4 * H)); p['whh1b'] = u(keys[14], (H, 4 * H))
    p['b1b'] = u(keys[15], (1, 4 * H)) + u(keys[16], (1, 4 * H))
    # fully connected: PyTorch Linear(D, C) weight is [C, D]; stored transposed.
    fb = 1.0 / jnp.sqrt(jnp.float32(D))
    p['fcw'] = jax.random.uniform(keys[17], (D, C), jnp.float32, -fb, fb)
    p['fcb'] = jax.random.uniform(keys[18], (1, C), jnp.float32, -fb, fb)
    return p


# --------------------------- pure-JAX reference -----------------------------
def reference_forward(x_ids, p):
    embed = jnp.take(p['emb'], x_ids, axis=0).astype(jnp.float32)

    def cell(x_in, h, c, w_ih, w_hh, b):
        g = x_in @ w_ih + h @ w_hh + b
        i = jax.nn.sigmoid(g[:, :H]); f = jax.nn.sigmoid(g[:, H:2 * H])
        gg = jnp.tanh(g[:, 2 * H:3 * H]); o = jax.nn.sigmoid(g[:, 3 * H:])
        c = f * c + i * gg
        return o * jnp.tanh(c), c

    def run(inp, w_ih, w_hh, b, reverse):
        h = jnp.zeros((B, H), jnp.float32); c = jnp.zeros((B, H), jnp.float32)
        outs = [None] * L
        ts = range(L - 1, -1, -1) if reverse else range(L)
        for t in ts:
            h, c = cell(inp[:, t, :], h, c, w_ih, w_hh, b)
            outs[t] = h
        return jnp.stack(outs, axis=1)

    h0f = run(embed, p['wih0f'], p['whh0f'], p['b0f'], False)
    h0b = run(embed, p['wih0b'], p['whh0b'], p['b0b'], True)
    # TODO(synk): inter-layer dropout omitted (PyTorch applies it only in training mode).
    l1_in = jnp.concatenate([h0f, h0b], axis=2)
    h1f = run(l1_in, p['wih1f'], p['whh1f'], p['b1f'], False)
    h1b = run(l1_in, p['wih1b'], p['whh1b'], p['b1b'], True)
    last_hidden = jnp.concatenate([h1f, h1b], axis=2)
    out = jnp.tanh(jnp.concatenate([embed, last_hidden], axis=2))   # [B, L, D]
    pooled = jnp.max(out, axis=1)                                   # [B, D]
    return pooled @ p['fcw'] + p['fcb']


if __name__ == "__main__":
    key = jax.random.PRNGKey(0)
    pkey, xkey = jax.random.split(key)
    params = init_params(pkey)
    x = jax.random.randint(xkey, (B, L), 0, VOCAB, dtype=jnp.int32)

    out = textrcnn_forward(x, params)
    out = jax.block_until_ready(out)

    ref = reference_forward(x, params)
    assert out.shape == (B, C)
    assert jnp.allclose(out, ref, rtol=1e-3, atol=1e-3), (out, ref)
    print("KERNEL_OK")
</pallas_src>

<mosaic_0001>
module attributes {stable_mosaic.version = 11 : i64} {
  func.func @rcnn_kernel(%arg0: memref<64x32xf32, #tpu.memory_space<vmem>>, %arg1: memref<32x256xf32, #tpu.memory_space<vmem>>, %arg2: memref<1x256xf32, #tpu.memory_space<vmem>>, %arg3: memref<64x256xf32, #tpu.memory_space<vmem>>, %arg4: memref<64x256xf32, #tpu.memory_space<vmem>>, %arg5: memref<64x256xf32, #tpu.memory_space<vmem>>, %arg6: memref<1x256xf32, #tpu.memory_space<vmem>>, %arg7: memref<64x256xf32, #tpu.memory_space<vmem>>, %arg8: memref<8x16xf32, #tpu.memory_space<vmem>>, %arg9: memref<80x128xf32, #tpu.memory_space<vmem>>, %arg10: memref<1x128xf32, #tpu.memory_space<vmem>>, %arg11: memref<8x128xf32, #tpu.memory_space<vmem>>, %arg12: memref<64x64xf32, #tpu.memory_space<vmem>>, %arg13: memref<64x64xf32, #tpu.memory_space<vmem>>) attributes {dimension_semantics = [], scalar_prefetch = 0 : i64, scratch_operands = 2 : i64, tpu.core_type = #tpu.core_type<tc>} {
    %c0 = arith.constant 0 : index
    %c0_0 = arith.constant 0 : index
    %0 = vector.load %arg0[%c0, %c0_0] : memref<64x32xf32, #tpu.memory_space<vmem>>, vector<64x32xf32>
    %c0_1 = arith.constant 0 : index
    %c0_2 = arith.constant 0 : index
    %1 = vector.load %arg1[%c0_1, %c0_2] : memref<32x256xf32, #tpu.memory_space<vmem>>, vector<32x256xf32>
    %cst = arith.constant dense<0.000000e+00> : vector<64x256xf32>
    %2 = tpu.matmul %0, %1, %cst {dimension_numbers = #tpu.dot_dimension_numbers<[1], [0], [0], [1], [0, 0, 1, 1], [], []>} : vector<64x32xf32>, vector<32x256xf32>, vector<64x256xf32> -> vector<64x256xf32>
    %c0_3 = arith.constant 0 : index
    %c0_4 = arith.constant 0 : index
    %3 = vector.load %arg2[%c0_3, %c0_4] : memref<1x256xf32, #tpu.memory_space<vmem>>, vector<1x256xf32>
    %4 = vector.broadcast %3 : vector<1x256xf32> to vector<64x256xf32>
    %5 = arith.addf %2, %4 : vector<64x256xf32>
    %c0_5 = arith.constant 0 : index
    %c0_6 = arith.constant 0 : index
    %6 = vector.load %arg3[%c0_5, %c0_6] : memref<64x256xf32, #tpu.memory_space<vmem>>, vector<64x256xf32>
    %cst_7 = arith.constant 0.000000e+00 : f32
    %7 = vector.broadcast %cst_7 : f32 to vector<8x64xf32>
    %cst_8 = arith.constant 0.000000e+00 : f32
    %8 = vector.broadcast %cst_8 : f32 to vector<8x64xf32>
    %9 = vector.extract_strided_slice %5 {offsets = [0, 0], sizes = [8, 256], strides = [1, 1]} : vector<64x256xf32> to vector<8x256xf32>
    %cst_9 = arith.constant dense<0.000000e+00> : vector<8x256xf32>
    %10 = tpu.matmul %7, %6, %cst_9 {dimension_numbers = #tpu.dot_dimension_numbers<[1], [0], [0], [1], [0, 0, 1, 1], [], []>} : vector<8x64xf32>, vector<64x256xf32>, vector<8x256xf32> -> vector<8x256xf32>
    %11 = arith.addf %9, %10 : vector<8x256xf32>
    %12 = math.tanh %11 : vector<8x256xf32>
    %13 = vector.extract_strided_slice %12 {offsets = [0, 0], sizes = [8, 192], strides = [1, 1]} : vector<8x256xf32> to vector<8x192xf32>
    %cst_10 = arith.constant 5.000000e-01 : f32
    %14 = vector.broadcast %cst_10 : f32 to vector<8x192xf32>
    %15 = arith.mulf %14, %13 : vector<8x192xf32>
    %cst_11 = arith.constant 5.000000e-01 : f32
    %16 = vector.broadcast %cst_11 : f32 to vector<8x192xf32>
    %17 = arith.addf %15, %16 : vector<8x192xf32>
    %18 = vector.extract_strided_slice %17 {offsets = [0, 0], sizes = [8, 64], strides = [1, 1]} : vector<8x192xf32> to vector<8x64xf32>
    %19 = vector.extract_strided_slice %17 {offsets = [0, 64], sizes = [8, 64], strides = [1, 1]} : vector<8x192xf32> to vector<8x64xf32>
    %20 = vector.extract_strided_slice %17 {offsets = [0, 128], sizes = [8, 64], strides = [1, 1]} : vector<8x192xf32> to vector<8x64xf32>
    %21 = vector.extract_strided_slice %12 {offsets = [0, 192], sizes = [8, 64], strides = [1, 1]} : vector<8x256xf32> to vector<8x64xf32>
    %22 = arith.mulf %19, %8 : vector<8x64xf32>
    %23 = arith.mulf %18, %21 : vector<8x64xf32>
    %24 = arith.addf %22, %23 : vector<8x64xf32>
    %25 = math.tanh %24 : vector<8x64xf32>
    %26 = arith.mulf %20, %25 : vector<8x64xf32>
    %c0_12 = arith.constant 0 : index
    %c0_13 = arith.constant 0 : index
    %27 = vector.load %arg12[%c0_12, %c0_13] : memref<64x64xf32, #tpu.memory_space<vmem>>, vector<8x64xf32>
    tpu.vector_store %arg12[%c0_12, %c0_13], %26 {strides = array<i32>} : memref<64x64xf32, #tpu.memory_space<vmem>>, vector<8x64xf32>,
    %c56 = arith.constant 56 : index
    %c0_14 = arith.constant 0 : index
    %28 = vector.load %arg13[%c56, %c0_14] : memref<64x64xf32, #tpu.memory_space<vmem>>, vector<8x64xf32>
    tpu.vector_store %arg13[%c56, %c0_14], %26 {strides = array<i32>} : memref<64x64xf32, #tpu.memory_space<vmem>>, vector<8x64xf32>,
    %29 = vector.extract_strided_slice %5 {offsets = [8, 0], sizes = [8, 256], strides = [1, 1]} : vector<64x256xf32> to vector<8x256xf32>
    %cst_15 = arith.constant dense<0.000000e+00> : vector<8x256xf32>
    %30 = tpu.matmul %26, %6, %cst_15 {dimension_numbers = #tpu.dot_dimension_numbers<[1], [0], [0], [1], [0, 0, 1, 1], [], []>} : vector<8x64xf32>, vector<64x256xf32>, vector<8x256xf32> -> vector<8x256xf32>
    %31 = arith.addf %29, %30 : vector<8x256xf32>
    %32 = math.tanh %31 : vector<8x256xf32>
    %33 = vector.extract_strided_slice %32 {offsets = [0, 0], sizes = [8, 192], strides = [1, 1]} : vector<8x256xf32> to vector<8x192xf32>
    %cst_16 = arith.constant 5.000000e-01 : f32
    %34 = vector.broadcast %cst_16 : f32 to vector<8x192xf32>
    %35 = arith.mulf %34, %33 : vector<8x192xf32>
    %cst_17 = arith.constant 5.000000e-01 : f32
    %36 = vector.broadcast %cst_17 : f32 to vector<8x192xf32>
    %37 = arith.addf %35, %36 : vector<8x192xf32>
    %38 = vector.extract_strided_slice %37 {offsets = [0, 0], sizes = [8, 64], strides = [1, 1]} : vector<8x192xf32> to vector<8x64xf32>
    %39 = vector.extract_strided_slice %37 {offsets = [0, 64], sizes = [8, 64], strides = [1, 1]} : vector<8x192xf32> to vector<8x64xf32>
    %40 = vector.extract_strided_slice %37 {offsets = [0, 128], sizes = [8, 64], strides = [1, 1]} : vector<8x192xf32> to vector<8x64xf32>
    %41 = vector.extract_strided_slice %32 {offsets = [0, 192], sizes = [8, 64], strides = [1, 1]} : vector<8x256xf32> to vector<8x64xf32>
    %42 = arith.mulf %39, %24 : vector<8x64xf32>
    %43 = arith.mulf %38, %41 : vector<8x64xf32>
    %44 = arith.addf %42, %43 : vector<8x64xf32>
    %45 = math.tanh %44 : vector<8x64xf32>
    %46 = arith.mulf %40, %45 : vector<8x64xf32>
    %c8 = arith.constant 8 : index
    %c0_18 = arith.constant 0 : index
    %47 = vector.load %arg12[%c8, %c0_18] : memref<64x64xf32, #tpu.memory_space<vmem>>, vector<8x64xf32>
    tpu.vector_store %arg12[%c8, %c0_18], %46 {strides = array<i32>} : memref<64x64xf32, #tpu.memory_space<vmem>>, vector<8x64xf32>,
    %c48 = arith.constant 48 : index
    %c0_19 = arith.constant 0 : index
    %48 = vector.load %arg13[%c48, %c0_19] : memref<64x64xf32, #tpu.memory_space<vmem>>, vector<8x64xf32>
    tpu.vector_store %arg13[%c48, %c0_19], %46 {strides = array<i32>} : memref<64x64xf32, #tpu.memory_space<vmem>>, vector<8x64xf32>,
    %49 = vector.extract_strided_slice %5 {offsets = [16, 0], sizes = [8, 256], strides = [1, 1]} : vector<64x256xf32> to vector<8x256xf32>
    %cst_20 = arith.constant dense<0.000000e+00> : vector<8x256xf32>
    %50 = tpu.matmul %46, %6, %cst_20 {dimension_numbers = #tpu.dot_dimension_numbers<[1], [0], [0], [1], [0, 0, 1, 1], [], []>} : vector<8x64xf32>, vector<64x256xf32>, vector<8x256xf32> -> vector<8x256xf32>
    %51 = arith.addf %49, %50 : vector<8x256xf32>
    %52 = math.tanh %51 : vector<8x256xf32>
    %53 = vector.extract_strided_slice %52 {offsets = [0, 0], sizes = [8, 192], strides = [1, 1]} : vector<8x256xf32> to vector<8x192xf32>
    %cst_21 = arith.constant 5.000000e-01 : f32
    %54 = vector.broadcast %cst_21 : f32 to vector<8x192xf32>
    %55 = arith.mulf %54, %53 : vector<8x192xf32>
    %cst_22 = arith.constant 5.000000e-01 : f32
    %56 = vector.broadcast %cst_22 : f32 to vector<8x192xf32>
    %57 = arith.addf %55, %56 : vector<8x192xf32>
    %58 = vector.extract_strided_slice %57 {offsets = [0, 0], sizes = [8, 64], strides = [1, 1]} : vector<8x192xf32> to vector<8x64xf32>
    %59 = vector.extract_strided_slice %57 {offsets = [0, 64], sizes = [8, 64], strides = [1, 1]} : vector<8x192xf32> to vector<8x64xf32>
    %60 = vector.extract_strided_slice %57 {offsets = [0, 128], sizes = [8, 64], strides = [1, 1]} : vector<8x192xf32> to vector<8x64xf32>
    %61 = vector.extract_strided_slice %52 {offsets = [0, 192], sizes = [8, 64], strides = [1, 1]} : vector<8x256xf32> to vector<8x64xf32>
    %62 = arith.mulf %59, %44 : vector<8x64xf32>
    %63 = arith.mulf %58, %61 : vector<8x64xf32>
    %64 = arith.addf %62, %63 : vector<8x64xf32>
    %65 = math.tanh %64 : vector<8x64xf32>
    %66 = arith.mulf %60, %65 : vector<8x64xf32>
    %c16 = arith.constant 16 : index
    %c0_23 = arith.constant 0 : index
    %67 = vector.load %arg12[%c16, %c0_23] : memref<64x64xf32, #tpu.memory_space<vmem>>, vector<8x64xf32>
    tpu.vector_store %arg12[%c16, %c0_23], %66 {strides = array<i32>} : memref<64x64xf32, #tpu.memory_space<vmem>>, vector<8x64xf32>,
    %c40 = arith.constant 40 : index
    %c0_24 = arith.constant 0 : index
    %68 = vector.load %arg13[%c40, %c0_24] : memref<64x64xf32, #tpu.memory_space<vmem>>, vector<8x64xf32>
    tpu.vector_store %arg13[%c40, %c0_24], %66 {strides = array<i32>} : memref<64x64xf32, #tpu.memory_space<vmem>>, vector<8x64xf32>,
    %69 = vector.extract_strided_slice %5 {offsets = [24, 0], sizes = [8, 256], strides = [1, 1]} : vector<64x256xf32> to vector<8x256xf32>
    %cst_25 = arith.constant dense<0.000000e+00> : vector<8x256xf32>
    %70 = tpu.matmul %66, %6, %cst_25 {dimension_numbers = #tpu.dot_dimension_numbers<[1], [0], [0], [1], [0, 0, 1, 1], [], []>} : vector<8x64xf32>, vector<64x256xf32>, vector<8x256xf32> -> vector<8x256xf32>
    %71 = arith.addf %69, %70 : vector<8x256xf32>
    %72 = math.tanh %71 : vector<8x256xf32>
    %73 = vector.extract_strided_slice %72 {offsets = [0, 0], sizes = [8, 192], strides = [1, 1]} : vector<8x256xf32> to vector<8x192xf32>
    %cst_26 = arith.constant 5.000000e-01 : f32
    %74 = vector.broadcast %cst_26 : f32 to vector<8x192xf32>
    %75 = arith.mulf %74, %73 : vector<8x192xf32>
    %cst_27 = arith.constant 5.000000e-01 : f32
    %76 = vector.broadcast %cst_27 : f32 to vector<8x192xf32>
    %77 = arith.addf %75, %76 : vector<8x192xf32>
    %78 = vector.extract_strided_slice %77 {offsets = [0, 0], sizes = [8, 64], strides = [1, 1]} : vector<8x192xf32> to vector<8x64xf32>
    %79 = vector.extract_strided_slice %77 {offsets = [0, 64], sizes = [8, 64], strides = [1, 1]} : vector<8x192xf32> to vector<8x64xf32>
    %80 = vector.extract_strided_slice %77 {offsets = [0, 128], sizes = [8, 64], strides = [1, 1]} : vector<8x192xf32> to vector<8x64xf32>
    %81 = vector.extract_strided_slice %72 {offsets = [0, 192], sizes = [8, 64], strides = [1, 1]} : vector<8x256xf32> to vector<8x64xf32>
    %82 = arith.mulf %79, %64 : vector<8x64xf32>
    %83 = arith.mulf %78, %81 : vector<8x64xf32>
    %84 = arith.addf %82, %83 : vector<8x64xf32>
    %85 = math.tanh %84 : vector<8x64xf32>
    %86 = arith.mulf %80, %85 : vector<8x64xf32>
    %c24 = arith.constant 24 : index
    %c0_28 = arith.constant 0 : index
    %87 = vector.load %arg12[%c24, %c0_28] : memref<64x64xf32, #tpu.memory_space<vmem>>, vector<8x64xf32>
    tpu.vector_store %arg12[%c24, %c0_28], %86 {strides = array<i32>} : memref<64x64xf32, #tpu.memory_space<vmem>>, vector<8x64xf32>,
    %c32 = arith.constant 32 : index
    %c0_29 = arith.constant 0 : index
    %88 = vector.load %arg13[%c32, %c0_29] : memref<64x64xf32, #tpu.memory_space<vmem>>, vector<8x64xf32>
    tpu.vector_store %arg13[%c32, %c0_29], %86 {strides = array<i32>} : memref<64x64xf32, #tpu.memory_space<vmem>>, vector<8x64xf32>,
    %89 = vector.extract_strided_slice %5 {offsets = [32, 0], sizes = [8, 256], strides = [1, 1]} : vector<64x256xf32> to vector<8x256xf32>
    %cst_30 = arith.constant dense<0.000000e+00> : vector<8x256xf32>
    %90 = tpu.matmul %86, %6, %cst_30 {dimension_numbers = #tpu.dot_dimension_numbers<[1], [0], [0], [1], [0, 0, 1, 1], [], []>} : vector<8x64xf32>, vector<64x256xf32>, vector<8x256xf32> -> vector<8x256xf32>
    %91 = arith.addf %89, %90 : vector<8x256xf32>
    %92 = math.tanh %91 : vector<8x256xf32>
    %93 = vector.extract_strided_slice %92 {offsets = [0, 0], sizes = [8, 192], strides = [1, 1]} : vector<8x256xf32> to vector<8x192xf32>
    %cst_31 = arith.constant 5.000000e-01 : f32
    %94 = vector.broadcast %cst_31 : f32 to vector<8x192xf32>
    %95 = arith.mulf %94, %93 : vector<8x192xf32>
    %cst_32 = arith.constant 5.000000e-01 : f32
    %96 = vector.broadcast %cst_32 : f32 to vector<8x192xf32>
    %97 = arith.addf %95, %96 : vector<8x192xf32>
    %98 = vector.extract_strided_slice %97 {offsets = [0, 0], sizes = [8, 64], strides = [1, 1]} : vector<8x192xf32> to vector<8x64xf32>
    %99 = vector.extract_strided_slice %97 {offsets = [0, 64], sizes = [8, 64], strides = [1, 1]} : vector<8x192xf32> to vector<8x64xf32>
    %100 = vector.extract_strided_slice %97 {offsets = [0, 128], sizes = [8, 64], strides = [1, 1]} : vector<8x192xf32> to vector<8x64xf32>
    %101 = vector.extract_strided_slice %92 {offsets = [0, 192], sizes = [8, 64], strides = [1, 1]} : vector<8x256xf32> to vector<8x64xf32>
    %102 = arith.mulf %99, %84 : vector<8x64xf32>
    %103 = arith.mulf %98, %101 : vector<8x64xf32>
    %104 = arith.addf %102, %103 : vector<8x64xf32>
    %105 = math.tanh %104 : vector<8x64xf32>
    %106 = arith.mulf %100, %105 : vector<8x64xf32>
    %c32_33 = arith.constant 32 : index
    %c0_34 = arith.constant 0 : index
    %107 = vector.load %arg12[%c32_33, %c0_34] : memref<64x64xf32, #tpu.memory_space<vmem>>, vector<8x64xf32>
    tpu.vector_store %arg12[%c32_33, %c0_34], %106 {strides = array<i32>} : memref<64x64xf32, #tpu.memory_space<vmem>>, vector<8x64xf32>,
    %c24_35 = arith.constant 24 : index
    %c0_36 = arith.constant 0 : index
    %108 = vector.load %arg13[%c24_35, %c0_36] : memref<64x64xf32, #tpu.memory_space<vmem>>, vector<8x64xf32>
    tpu.vector_store %arg13[%c24_35, %c0_36], %106 {strides = array<i32>} : memref<64x64xf32, #tpu.memory_space<vmem>>, vector<8x64xf32>,
    %109 = vector.extract_strided_slice %5 {offsets = [40, 0], sizes = [8, 256], strides = [1, 1]} : vector<64x256xf32> to vector<8x256xf32>
    %cst_37 = arith.constant dense<0.000000e+00> : vector<8x256xf32>
    %110 = tpu.matmul %106, %6, %cst_37 {dimension_numbers = #tpu.dot_dimension_numbers<[1], [0], [0], [1], [0, 0, 1, 1], [], []>} : vector<8x64xf32>, vector<64x256xf32>, vector<8x256xf32> -> vector<8x256xf32>
    %111 = arith.addf %109, %110 : vector<8x256xf32>
    %112 = math.tanh %111 : vector<8x256xf32>
    %113 = vector.extract_strided_slice %112 {offsets = [0, 0], sizes = [8, 192], strides = [1, 1]} : vector<8x256xf32> to vector<8x192xf32>
    %cst_38 = arith.constant 5.000000e-01 : f32
    %114 = vector.broadcast %cst_38 : f32 to vector<8x192xf32>
    %115 = arith.mulf %114, %113 : vector<8x192xf32>
    %cst_39 = arith.constant 5.000000e-01 : f32
    %116 = vector.broadcast %cst_39 : f32 to vector<8x192xf32>
    %117 = arith.addf %115, %116 : vector<8x192xf32>
    %118 = vector.extract_strided_slice %117 {offsets = [0, 0], sizes = [8, 64], strides = [1, 1]} : vector<8x192xf32> to vector<8x64xf32>
    %119 = vector.extract_strided_slice %117 {offsets = [0, 64], sizes = [8, 64], strides = [1, 1]} : vector<8x192xf32> to vector<8x64xf32>
    %120 = vector.extract_strided_slice %117 {offsets = [0, 128], sizes = [8, 64], strides = [1, 1]} : vector<8x192xf32> to vector<8x64xf32>
    %121 = vector.extract_strided_slice %112 {offsets = [0, 192], sizes = [8, 64], strides = [1, 1]} : vector<8x256xf32> to vector<8x64xf32>
    %122 = arith.mulf %119, %104 : vector<8x64xf32>
    %123 = arith.mulf %118, %121 : vector<8x64xf32>
    %124 = arith.addf %122, %123 : vector<8x64xf32>
    %125 = math.tanh %124 : vector<8x64xf32>
    %126 = arith.mulf %120, %125 : vector<8x64xf32>
    %c40_40 = arith.constant 40 : index
    %c0_41 = arith.constant 0 : index
    %127 = vector.load %arg12[%c40_40, %c0_41] : memref<64x64xf32, #tpu.memory_space<vmem>>, vector<8x64xf32>
    tpu.vector_store %arg12[%c40_40, %c0_41], %126 {strides = array<i32>} : memref<64x64xf32, #tpu.memory_space<vmem>>, vector<8x64xf32>,
    %c16_42 = arith.constant 16 : index
    %c0_43 = arith.constant 0 : index
    %128 = vector.load %arg13[%c16_42, %c0_43] : memref<64x64xf32, #tpu.memory_space<vmem>>, vector<8x64xf32>
    tpu.vector_store %arg13[%c16_42, %c0_43], %126 {strides = array<i32>} : memref<64x64xf32, #tpu.memory_space<vmem>>, vector<8x64xf32>,
    %129 = vector.extract_strided_slice %5 {offsets = [48, 0], sizes = [8, 256], strides = [1, 1]} : vector<64x256xf32> to vector<8x256xf32>
    %cst_44 = arith.constant dense<0.000000e+00> : vector<8x256xf32>
    %130 = tpu.matmul %126, %6, %cst_44 {dimension_numbers = #tpu.dot_dimension_numbers<[1], [0], [0], [1], [0, 0, 1, 1], [], []>} : vector<8x64xf32>, vector<64x256xf32>, vector<8x256xf32> -> vector<8x256xf32>
    %131 = arith.addf %129, %130 : vector<8x256xf32>
    %132 = math.tanh %131 : vector<8x256xf32>
    %133 = vector.extract_strided_slice %132 {offsets = [0, 0], sizes = [8, 192], strides = [1, 1]} : vector<8x256xf32> to vector<8x192xf32>
    %cst_45 = arith.constant 5.000000e-01 : f32
    %134 = vector.broadcast %cst_45 : f32 to vector<8x192xf32>
    %135 = arith.mulf %134, %133 : vector<8x192xf32>
    %cst_46 = arith.constant 5.000000e-01 : f32
    %136 = vector.broadcast %cst_46 : f32 to vector<8x192xf32>
    %137 = arith.addf %135, %136 : vector<8x192xf32>
    %138 = vector.extract_strided_slice %137 {offsets = [0, 0], sizes = [8, 64], strides = [1, 1]} : vector<8x192xf32> to vector<8x64xf32>
    %139 = vector.extract_strided_slice %137 {offsets = [0, 64], sizes = [8, 64], strides = [1, 1]} : vector<8x192xf32> to vector<8x64xf32>
    %140 = vector.extract_strided_slice %137 {offsets = [0, 128], sizes = [8, 64], strides = [1, 1]} : vector<8x192xf32> to vector<8x64xf32>
    %141 = vector.extract_strided_slice %132 {offsets = [0, 192], sizes = [8, 64], strides = [1, 1]} : vector<8x256xf32> to vector<8x64xf32>
    %142 = arith.mulf %139, %124 : vector<8x64xf32>
    %143 = arith.mulf %138, %141 : vector<8x64xf32>
    %144 = arith.addf %142, %143 : vector<8x64xf32>
    %145 = math.tanh %144 : vector<8x64xf32>
    %146 = arith.mulf %140, %145 : vector<8x64xf32>
    %c48_47 = arith.constant 48 : index
    %c0_48 = arith.constant 0 : index
    %147 = vector.load %arg12[%c48_47, %c0_48] : memref<64x64xf32, #tpu.memory_space<vmem>>, vector<8x64xf32>
    tpu.vector_store %arg12[%c48_47, %c0_48], %146 {strides = array<i32>} : memref<64x64xf32, #tpu.memory_space<vmem>>, vector<8x64xf32>,
    %c8_49 = arith.constant 8 : index
    %c0_50 = arith.constant 0 : index
    %148 = vector.load %arg13[%c8_49, %c0_50] : memref<64x64xf32, #tpu.memory_space<vmem>>, vector<8x64xf32>
    tpu.vector_store %arg13[%c8_49, %c0_50], %146 {strides = array<i32>} : memref<64x64xf32, #tpu.memory_space<vmem>>, vector<8x64xf32>,
    %149 = vector.extract_strided_slice %5 {offsets = [56, 0], sizes = [8, 256], strides = [1, 1]} : vector<64x256xf32> to vector<8x256xf32>
    %cst_51 = arith.constant dense<0.000000e+00> : vector<8x256xf32>
    %150 = tpu.matmul %146, %6, %cst_51 {dimension_numbers = #tpu.dot_dimension_numbers<[1], [0], [0], [1], [0, 0, 1, 1], [], []>} : vector<8x64xf32>, vector<64x256xf32>, vector<8x256xf32> -> vector<8x256xf32>
    %151 = arith.addf %149, %150 : vector<8x256xf32>
    %152 = math.tanh %151 : vector<8x256xf32>
    %153 = vector.extract_strided_slice %152 {offsets = [0, 0], sizes = [8, 192], strides = [1, 1]} : vector<8x256xf32> to vector<8x192xf32>
    %cst_52 = arith.constant 5.000000e-01 : f32
    %154 = vector.broadcast %cst_52 : f32 to vector<8x192xf32>
    %155 = arith.mulf %154, %153 : vector<8x192xf32>
    %cst_53 = arith.constant 5.000000e-01 : f32
    %156 = vector.broadcast %cst_53 : f32 to vector<8x192xf32>
    %157 = arith.addf %155, %156 : vector<8x192xf32>
    %158 = vector.extract_strided_slice %157 {offsets = [0, 0], sizes = [8, 64], strides = [1, 1]} : vector<8x192xf32> to vector<8x64xf32>
    %159 = vector.extract_strided_slice %157 {offsets = [0, 64], sizes = [8, 64], strides = [1, 1]} : vector<8x192xf32> to vector<8x64xf32>
    %160 = vector.extract_strided_slice %157 {offsets = [0, 128], sizes = [8, 64], strides = [1, 1]} : vector<8x192xf32> to vector<8x64xf32>
    %161 = vector.extract_strided_slice %152 {offsets = [0, 192], sizes = [8, 64], strides = [1, 1]} : vector<8x256xf32> to vector<8x64xf32>
    %162 = arith.mulf %159, %144 : vector<8x64xf32>
    %163 = arith.mulf %158, %161 : vector<8x64xf32>
    %164 = arith.addf %162, %163 : vector<8x64xf32>
    %165 = math.tanh %164 : vector<8x64xf32>
    %166 = arith.mulf %160, %165 : vector<8x64xf32>
    %c56_54 = arith.constant 56 : index
    %c0_55 = arith.constant 0 : index
    %167 = vector.load %arg12[%c56_54, %c0_55] : memref<64x64xf32, #tpu.memory_space<vmem>>, vector<8x64xf32>
    tpu.vector_store %arg12[%c56_54, %c0_55], %166 {strides = array<i32>} : memref<64x64xf32, #tpu.memory_space<vmem>>, vector<8x64xf32>,
    %c0_56 = arith.constant 0 : index
    %c0_57 = arith.constant 0 : index
    %168 = vector.load %arg13[%c0_56, %c0_57] : memref<64x64xf32, #tpu.memory_space<vmem>>, vector<8x64xf32>
    tpu.vector_store %arg13[%c0_56, %c0_57], %166 {strides = array<i32>} : memref<64x64xf32, #tpu.memory_space<vmem>>, vector<8x64xf32>,
    %c0_58 = arith.constant 0 : index
    %c0_59 = arith.constant 0 : index
    %169 = vector.load %arg12[%c0_58, %c0_59] : memref<64x64xf32, #tpu.memory_space<vmem>>, vector<64x64xf32>
    %c0_60 = arith.constant 0 : index
    %c0_61 = arith.constant 0 : index
    %170 = vector.load %arg4[%c0_60, %c0_61] : memref<64x256xf32, #tpu.memory_space<vmem>>, vector<64x256xf32>
    %cst_62 = arith.constant dense<0.000000e+00> : vector<64x256xf32>
    %171 = tpu.matmul %169, %170, %cst_62 {dimension_numbers = #tpu.dot_dimension_numbers<[1], [0], [0], [1], [0, 0, 1, 1], [], []>} : vector<64x64xf32>, vector<64x256xf32>, vector<64x256xf32> -> vector<64x256xf32>
    %c0_63 = arith.constant 0 : index
    %c0_64 = arith.constant 0 : index
    %172 = vector.load %arg13[%c0_63, %c0_64] : memref<64x64xf32, #tpu.memory_space<vmem>>, vector<64x64xf32>
    %c0_65 = arith.constant 0 : index
    %c0_66 = arith.constant 0 : index
    %173 = vector.load %arg5[%c0_65, %c0_66] : memref<64x256xf32, #tpu.memory_space<vmem>>, vector<64x256xf32>
    %cst_67 = arith.constant dense<0.000000e+00> : vector<64x256xf32>
    %174 = tpu.matmul %172, %173, %cst_67 {dimension_numbers = #tpu.dot_dimension_numbers<[1], [0], [0], [1], [0, 0, 1, 1], [], []>} : vector<64x64xf32>, vector<64x256xf32>, vector<64x256xf32> -> vector<64x256xf32>
    %175 = arith.addf %171, %174 : vector<64x256xf32>
    %c0_68 = arith.constant 0 : index
    %c0_69 = arith.constant 0 : index
    %176 = vector.load %arg6[%c0_68, %c0_69] : memref<1x256xf32, #tpu.memory_space<vmem>>, vector<1x256xf32>
    %177 = vector.broadcast %176 : vector<1x256xf32> to vector<64x256xf32>
    %178 = arith.addf %175, %177 : vector<64x256xf32>
    %c0_70 = arith.constant 0 : index
    %c0_71 = arith.constant 0 : index
    %179 = vector.load %arg7[%c0_70, %c0_71] : memref<64x256xf32, #tpu.memory_space<vmem>>, vector<64x256xf32>
    %cst_72 = arith.constant 0.000000e+00 : f32
    %180 = vector.broadcast %cst_72 : f32 to vector<8x64xf32>
    %cst_73 = arith.constant 0.000000e+00 : f32
    %181 = vector.broadcast %cst_73 : f32 to vector<8x64xf32>
    %cst_74 = arith.constant 0xFF800000 : f32
    %182 = vector.broadcast %cst_74 : f32 to vector<8x64xf32>
    %183 = vector.extract_strided_slice %178 {offsets = [0, 0], sizes = [8, 256], strides = [1, 1]} : vector<64x256xf32> to vector<8x256xf32>
    %cst_75 = arith.constant dense<0.000000e+00> : vector<8x256xf32>
    %184 = tpu.matmul %180, %179, %cst_75 {dimension_numbers = #tpu.dot_dimension_numbers<[1], [0], [0], [1], [0, 0, 1, 1], [], []>} : vector<8x64xf32>, vector<64x256xf32>, vector<8x256xf32> -> vector<8x256xf32>
    %185 = arith.addf %183, %184 : vector<8x256xf32>
    %186 = math.tanh %185 : vector<8x256xf32>
    %187 = vector.extract_strided_slice %186 {offsets = [0, 0], sizes = [8, 192], strides = [1, 1]} : vector<8x256xf32> to vector<8x192xf32>
    %cst_76 = arith.constant 5.000000e-01 : f32
    %188 = vector.broadcast %cst_76 : f32 to vector<8x192xf32>
    %189 = arith.mulf %188, %187 : vector<8x192xf32>
    %cst_77 = arith.constant 5.000000e-01 : f32
    %190 = vector.broadcast %cst_77 : f32 to vector<8x192xf32>
    %191 = arith.addf %189, %190 : vector<8x192xf32>
    %192 = vector.extract_strided_slice %191 {offsets = [0, 0], sizes = [8, 64], strides = [1, 1]} : vector<8x192xf32> to vector<8x64xf32>
    %193 = vector.extract_strided_slice %191 {offsets = [0, 64], sizes = [8, 64], strides = [1, 1]} : vector<8x192xf32> to vector<8x64xf32>
    %194 = vector.extract_strided_slice %191 {offsets = [0, 128], sizes = [8, 64], strides = [1, 1]} : vector<8x192xf32> to vector<8x64xf32>
    %195 = vector.extract_strided_slice %186 {offsets = [0, 192], sizes = [8, 64], strides = [1, 1]} : vector<8x256xf32> to vector<8x64xf32>
    %196 = arith.mulf %193, %181 : vector<8x64xf32>
    %197 = arith.mulf %192, %195 : vector<8x64xf32>
    %198 = arith.addf %196, %197 : vector<8x64xf32>
    %199 = math.tanh %198 : vector<8x64xf32>
    %200 = arith.mulf %194, %199 : vector<8x64xf32>
    %201 = arith.maximumf %182, %200 : vector<8x64xf32>
    %202 = vector.extract_strided_slice %178 {offsets = [8, 0], sizes = [8, 256], strides = [1, 1]} : vector<64x256xf32> to vector<8x256xf32>
    %cst_78 = arith.constant dense<0.000000e+00> : vector<8x256xf32>
    %203 = tpu.matmul %200, %179, %cst_78 {dimension_numbers = #tpu.dot_dimension_numbers<[1], [0], [0], [1], [0, 0, 1, 1], [], []>} : vector<8x64xf32>, vector<64x256xf32>, vector<8x256xf32> -> vector<8x256xf32>
    %204 = arith.addf %202, %203 : vector<8x256xf32>
    %205 = math.tanh %204 : vector<8x256xf32>
    %206 = vector.extract_strided_slice %205 {offsets = [0, 0], sizes = [8, 192], strides = [1, 1]} : vector<8x256xf32> to vector<8x192xf32>
    %cst_79 = arith.constant 5.000000e-01 : f32
    %207 = vector.broadcast %cst_79 : f32 to vector<8x192xf32>
    %208 = arith.mulf %207, %206 : vector<8x192xf32>
    %cst_80 = arith.constant 5.000000e-01 : f32
    %209 = vector.broadcast %cst_80 : f32 to vector<8x192xf32>
    %210 = arith.addf %208, %209 : vector<8x192xf32>
    %211 = vector.extract_strided_slice %210 {offsets = [0, 0], sizes = [8, 64], strides = [1, 1]} : vector<8x192xf32> to vector<8x64xf32>
    %212 = vector.extract_strided_slice %210 {offsets = [0, 64], sizes = [8, 64], strides = [1, 1]} : vector<8x192xf32> to vector<8x64xf32>
    %213 = vector.extract_strided_slice %210 {offsets = [0, 128], sizes = [8, 64], strides = [1, 1]} : vector<8x192xf32> to vector<8x64xf32>
    %214 = vector.extract_strided_slice %205 {offsets = [0, 192], sizes = [8, 64], strides = [1, 1]} : vector<8x256xf32> to vector<8x64xf32>
    %215 = arith.mulf %212, %198 : vector<8x64xf32>
    %216 = arith.mulf %211, %214 : vector<8x64xf32>
    %217 = arith.addf %215, %216 : vector<8x64xf32>
    %218 = math.tanh %217 : vector<8x64xf32>
    %219 = arith.mulf %213, %218 : vector<8x64xf32>
    %220 = arith.maximumf %201, %219 : vector<8x64xf32>
    %221 = vector.extract_strided_slice %178 {offsets = [16, 0], sizes = [8, 256], strides = [1, 1]} : vector<64x256xf32> to vector<8x256xf32>
    %cst_81 = arith.constant dense<0.000000e+00> : vector<8x256xf32>
    %222 = tpu.matmul %219, %179, %cst_81 {dimension_numbers = #tpu.dot_dimension_numbers<[1], [0], [0], [1], [0, 0, 1, 1], [], []>} : vector<8x64xf32>, vector<64x256xf32>, vector<8x256xf32> -> vector<8x256xf32>
    %223 = arith.addf %221, %222 : vector<8x256xf32>
    %224 = math.tanh %223 : vector<8x256xf32>
    %225 = vector.extract_strided_slice %224 {offsets = [0, 0], sizes = [8, 192], strides = [1, 1]} : vector<8x256xf32> to vector<8x192xf32>
    %cst_82 = arith.constant 5.000000e-01 : f32
    %226 = vector.broadcast %cst_82 : f32 to vector<8x192xf32>
    %227 = arith.mulf %226, %225 : vector<8x192xf32>
    %cst_83 = arith.constant 5.000000e-01 : f32
    %228 = vector.broadcast %cst_83 : f32 to vector<8x192xf32>
    %229 = arith.addf %227, %228 : vector<8x192xf32>
    %230 = vector.extract_strided_slice %229 {offsets = [0, 0], sizes = [8, 64], strides = [1, 1]} : vector<8x192xf32> to vector<8x64xf32>
    %231 = vector.extract_strided_slice %229 {offsets = [0, 64], sizes = [8, 64], strides = [1, 1]} : vector<8x192xf32> to vector<8x64xf32>
    %232 = vector.extract_strided_slice %229 {offsets = [0, 128], sizes = [8, 64], strides = [1, 1]} : vector<8x192xf32> to vector<8x64xf32>
    %233 = vector.extract_strided_slice %224 {offsets = [0, 192], sizes = [8, 64], strides = [1, 1]} : vector<8x256xf32> to vector<8x64xf32>
    %234 = arith.mulf %231, %217 : vector<8x64xf32>
    %235 = arith.mulf %230, %233 : vector<8x64xf32>
    %236 = arith.addf %234, %235 : vector<8x64xf32>
    %237 = math.tanh %236 : vector<8x64xf32>
    %238 = arith.mulf %232, %237 : vector<8x64xf32>
    %239 = arith.maximumf %220, %238 : vector<8x64xf32>
    %240 = vector.extract_strided_slice %178 {offsets = [24, 0], sizes = [8, 256], strides = [1, 1]} : vector<64x256xf32> to vector<8x256xf32>
    %cst_84 = arith.constant dense<0.000000e+00> : vector<8x256xf32>
    %241 = tpu.matmul %238, %179, %cst_84 {dimension_numbers = #tpu.dot_dimension_numbers<[1], [0], [0], [1], [0, 0, 1, 1], [], []>} : vector<8x64xf32>, vector<64x256xf32>, vector<8x256xf32> -> vector<8x256xf32>
    %242 = arith.addf %240, %241 : vector<8x256xf32>
    %243 = math.tanh %242 : vector<8x256xf32>
    %244 = vector.extract_strided_slice %243 {offsets = [0, 0], sizes = [8, 192], strides = [1, 1]} : vector<8x256xf32> to vector<8x192xf32>
    %cst_85 = arith.constant 5.000000e-01 : f32
    %245 = vector.broadcast %cst_85 : f32 to vector<8x192xf32>
    %246 = arith.mulf %245, %244 : vector<8x192xf32>
    %cst_86 = arith.constant 5.000000e-01 : f32
    %247 = vector.broadcast %cst_86 : f32 to vector<8x192xf32>
    %248 = arith.addf %246, %247 : vector<8x192xf32>
    %249 = vector.extract_strided_slice %248 {offsets = [0, 0], sizes = [8, 64], strides = [1, 1]} : vector<8x192xf32> to vector<8x64xf32>
    %250 = vector.extract_strided_slice %248 {offsets = [0, 64], sizes = [8, 64], strides = [1, 1]} : vector<8x192xf32> to vector<8x64xf32>
    %251 = vector.extract_strided_slice %248 {offsets = [0, 128], sizes = [8, 64], strides = [1, 1]} : vector<8x192xf32> to vector<8x64xf32>
    %252 = vector.extract_strided_slice %243 {offsets = [0, 192], sizes = [8, 64], strides = [1, 1]} : vector<8x256xf32> to vector<8x64xf32>
    %253 = arith.mulf %250, %236 : vector<8x64xf32>
    %254 = arith.mulf %249, %252 : vector<8x64xf32>
    %255 = arith.addf %253, %254 : vector<8x64xf32>
    %256 = math.tanh %255 : vector<8x64xf32>
    %257 = arith.mulf %251, %256 : vector<8x64xf32>
    %258 = arith.maximumf %239, %257 : vector<8x64xf32>
    %259 = vector.extract_strided_slice %178 {offsets = [32, 0], sizes = [8, 256], strides = [1, 1]} : vector<64x256xf32> to vector<8x256xf32>
    %cst_87 = arith.constant dense<0.000000e+00> : vector<8x256xf32>
    %260 = tpu.matmul %257, %179, %cst_87 {dimension_numbers = #tpu.dot_dimension_numbers<[1], [0], [0], [1], [0, 0, 1, 1], [], []>} : vector<8x64xf32>, vector<64x256xf32>, vector<8x256xf32> -> vector<8x256xf32>
    %261 = arith.addf %259, %260 : vector<8x256xf32>
    %262 = math.tanh %261 : vector<8x256xf32>
    %263 = vector.extract_strided_slice %262 {offsets = [0, 0], sizes = [8, 192], strides = [1, 1]} : vector<8x256xf32> to vector<8x192xf32>
    %cst_88 = arith.constant 5.000000e-01 : f32
    %264 = vector.broadcast %cst_88 : f32 to vector<8x192xf32>
    %265 = arith.mulf %264, %263 : vector<8x192xf32>
    %cst_89 = arith.constant 5.000000e-01 : f32
    %266 = vector.broadcast %cst_89 : f32 to vector<8x192xf32>
    %267 = arith.addf %265, %266 : vector<8x192xf32>
    %268 = vector.extract_strided_slice %267 {offsets = [0, 0], sizes = [8, 64], strides = [1, 1]} : vector<8x192xf32> to vector<8x64xf32>
    %269 = vector.extract_strided_slice %267 {offsets = [0, 64], sizes = [8, 64], strides = [1, 1]} : vector<8x192xf32> to vector<8x64xf32>
    %270 = vector.extract_strided_slice %267 {offsets = [0, 128], sizes = [8, 64], strides = [1, 1]} : vector<8x192xf32> to vector<8x64xf32>
    %271 = vector.extract_strided_slice %262 {offsets = [0, 192], sizes = [8, 64], strides = [1, 1]} : vector<8x256xf32> to vector<8x64xf32>
    %272 = arith.mulf %269, %255 : vector<8x64xf32>
    %273 = arith.mulf %268, %271 : vector<8x64xf32>
    %274 = arith.addf %272, %273 : vector<8x64xf32>
    %275 = math.tanh %274 : vector<8x64xf32>
    %276 = arith.mulf %270, %275 : vector<8x64xf32>
    %277 = arith.maximumf %258, %276 : vector<8x64xf32>
    %278 = vector.extract_strided_slice %178 {offsets = [40, 0], sizes = [8, 256], strides = [1, 1]} : vector<64x256xf32> to vector<8x256xf32>
    %cst_90 = arith.constant dense<0.000000e+00> : vector<8x256xf32>
    %279 = tpu.matmul %276, %179, %cst_90 {dimension_numbers = #tpu.dot_dimension_numbers<[1], [0], [0], [1], [0, 0, 1, 1], [], []>} : vector<8x64xf32>, vector<64x256xf32>, vector<8x256xf32> -> vector<8x256xf32>
    %280 = arith.addf %278, %279 : vector<8x256xf32>
    %281 = math.tanh %280 : vector<8x256xf32>
    %282 = vector.extract_strided_slice %281 {offsets = [0, 0], sizes = [8, 192], strides = [1, 1]} : vector<8x256xf32> to vector<8x192xf32>
    %cst_91 = arith.constant 5.000000e-01 : f32
    %283 = vector.broadcast %cst_91 : f32 to vector<8x192xf32>
    %284 = arith.mulf %283, %282 : vector<8x192xf32>
    %cst_92 = arith.constant 5.000000e-01 : f32
    %285 = vector.broadcast %cst_92 : f32 to vector<8x192xf32>
    %286 = arith.addf %284, %285 : vector<8x192xf32>
    %287 = vector.extract_strided_slice %286 {offsets = [0, 0], sizes = [8, 64], strides = [1, 1]} : vector<8x192xf32> to vector<8x64xf32>
    %288 = vector.extract_strided_slice %286 {offsets = [0, 64], sizes = [8, 64], strides = [1, 1]} : vector<8x192xf32> to vector<8x64xf32>
    %289 = vector.extract_strided_slice %286 {offsets = [0, 128], sizes = [8, 64], strides = [1, 1]} : vector<8x192xf32> to vector<8x64xf32>
    %290 = vector.extract_strided_slice %281 {offsets = [0, 192], sizes = [8, 64], strides = [1, 1]} : vector<8x256xf32> to vector<8x64xf32>
    %291 = arith.mulf %288, %274 : vector<8x64xf32>
    %292 = arith.mulf %287, %290 : vector<8x64xf32>
    %293 = arith.addf %291, %292 : vector<8x64xf32>
    %294 = math.tanh %293 : vector<8x64xf32>
    %295 = arith.mulf %289, %294 : vector<8x64xf32>
    %296 = arith.maximumf %277, %295 : vector<8x64xf32>
    %297 = vector.extract_strided_slice %178 {offsets = [48, 0], sizes = [8, 256], strides = [1, 1]} : vector<64x256xf32> to vector<8x256xf32>
    %cst_93 = arith.constant dense<0.000000e+00> : vector<8x256xf32>
    %298 = tpu.matmul %295, %179, %cst_93 {dimension_numbers = #tpu.dot_dimension_numbers<[1], [0], [0], [1], [0, 0, 1, 1], [], []>} : vector<8x64xf32>, vector<64x256xf32>, vector<8x256xf32> -> vector<8x256xf32>
    %299 = arith.addf %297, %298 : vector<8x256xf32>
    %300 = math.tanh %299 : vector<8x256xf32>
    %301 = vector.extract_strided_slice %300 {offsets = [0, 0], sizes = [8, 192], strides = [1, 1]} : vector<8x256xf32> to vector<8x192xf32>
    %cst_94 = arith.constant 5.000000e-01 : f32
    %302 = vector.broadcast %cst_94 : f32 to vector<8x192xf32>
    %303 = arith.mulf %302, %301 : vector<8x192xf32>
    %cst_95 = arith.constant 5.000000e-01 : f32
    %304 = vector.broadcast %cst_95 : f32 to vector<8x192xf32>
    %305 = arith.addf %303, %304 : vector<8x192xf32>
    %306 = vector.extract_strided_slice %305 {offsets = [0, 0], sizes = [8, 64], strides = [1, 1]} : vector<8x192xf32> to vector<8x64xf32>
    %307 = vector.extract_strided_slice %305 {offsets = [0, 64], sizes = [8, 64], strides = [1, 1]} : vector<8x192xf32> to vector<8x64xf32>
    %308 = vector.extract_strided_slice %305 {offsets = [0, 128], sizes = [8, 64], strides = [1, 1]} : vector<8x192xf32> to vector<8x64xf32>
    %309 = vector.extract_strided_slice %300 {offsets = [0, 192], sizes = [8, 64], strides = [1, 1]} : vector<8x256xf32> to vector<8x64xf32>
    %310 = arith.mulf %307, %293 : vector<8x64xf32>
    %311 = arith.mulf %306, %309 : vector<8x64xf32>
    %312 = arith.addf %310, %311 : vector<8x64xf32>
    %313 = math.tanh %312 : vector<8x64xf32>
    %314 = arith.mulf %308, %313 : vector<8x64xf32>
    %315 = arith.maximumf %296, %314 : vector<8x64xf32>
    %316 = vector.extract_strided_slice %178 {offsets = [56, 0], sizes = [8, 256], strides = [1, 1]} : vector<64x256xf32> to vector<8x256xf32>
    %cst_96 = arith.constant dense<0.000000e+00> : vector<8x256xf32>
    %317 = tpu.matmul %314, %179, %cst_96 {dimension_numbers = #tpu.dot_dimension_numbers<[1], [0], [0], [1], [0, 0, 1, 1], [], []>} : vector<8x64xf32>, vector<64x256xf32>, vector<8x256xf32> -> vector<8x256xf32>
    %318 = arith.addf %316, %317 : vector<8x256xf32>
    %319 = math.tanh %318 : vector<8x256xf32>
    %320 = vector.extract_strided_slice %319 {offsets = [0, 0], sizes = [8, 192], strides = [1, 1]} : vector<8x256xf32> to vector<8x192xf32>
    %cst_97 = arith.constant 5.000000e-01 : f32
    %321 = vector.broadcast %cst_97 : f32 to vector<8x192xf32>
    %322 = arith.mulf %321, %320 : vector<8x192xf32>
    %cst_98 = arith.constant 5.000000e-01 : f32
    %323 = vector.broadcast %cst_98 : f32 to vector<8x192xf32>
    %324 = arith.addf %322, %323 : vector<8x192xf32>
    %325 = vector.extract_strided_slice %324 {offsets = [0, 0], sizes = [8, 64], strides = [1, 1]} : vector<8x192xf32> to vector<8x64xf32>
    %326 = vector.extract_strided_slice %324 {offsets = [0, 64], sizes = [8, 64], strides = [1, 1]} : vector<8x192xf32> to vector<8x64xf32>
    %327 = vector.extract_strided_slice %324 {offsets = [0, 128], sizes = [8, 64], strides = [1, 1]} : vector<8x192xf32> to vector<8x64xf32>
    %328 = vector.extract_strided_slice %319 {offsets = [0, 192], sizes = [8, 64], strides = [1, 1]} : vector<8x256xf32> to vector<8x64xf32>
    %329 = arith.mulf %326, %312 : vector<8x64xf32>
    %330 = arith.mulf %325, %328 : vector<8x64xf32>
    %331 = arith.addf %329, %330 : vector<8x64xf32>
    %332 = math.tanh %331 : vector<8x64xf32>
    %333 = arith.mulf %327, %332 : vector<8x64xf32>
    %334 = arith.maximumf %315, %333 : vector<8x64xf32>
    %335 = math.tanh %334 : vector<8x64xf32>
    %c0_99 = arith.constant 0 : index
    %c0_100 = arith.constant 0 : index
    %336 = vector.load %arg9[%c0_99, %c0_100] : memref<80x128xf32, #tpu.memory_space<vmem>>, vector<80x128xf32>
    %c0_101 = arith.constant 0 : index
    %c0_102 = arith.constant 0 : index
    %337 = vector.load %arg8[%c0_101, %c0_102] : memref<8x16xf32, #tpu.memory_space<vmem>>, vector<8x16xf32>
    %338 = vector.extract_strided_slice %336 {offsets = [0, 0], sizes = [16, 128], strides = [1, 1]} : vector<80x128xf32> to vector<16x128xf32>
    %cst_103 = arith.constant dense<0.000000e+00> : vector<8x128xf32>
    %339 = tpu.matmul %337, %338, %cst_103 {dimension_numbers = #tpu.dot_dimension_numbers<[1], [0], [0], [1], [0, 0, 1, 1], [], []>} : vector<8x16xf32>, vector<16x128xf32>, vector<8x128xf32> -> vector<8x128xf32>
    %340 = vector.extract_strided_slice %336 {offsets = [16, 0], sizes = [64, 128], strides = [1, 1]} : vector<80x128xf32> to vector<64x128xf32>
    %cst_104 = arith.constant dense<0.000000e+00> : vector<8x128xf32>
    %341 = tpu.matmul %335, %340, %cst_104 {dimension_numbers = #tpu.dot_dimension_numbers<[1], [0], [0], [1], [0, 0, 1, 1], [], []>} : vector<8x64xf32>, vector<64x128xf32>, vector<8x128xf32> -> vector<8x128xf32>
    %342 = arith.addf %339, %341 : vector<8x128xf32>
    %c0_105 = arith.constant 0 : index
    %c0_106 = arith.constant 0 : index
    %343 = vector.load %arg10[%c0_105, %c0_106] : memref<1x128xf32, #tpu.memory_space<vmem>>, vector<1x128xf32>
    %344 = vector.broadcast %343 : vector<1x128xf32> to vector<8x128xf32>
    %345 = arith.addf %342, %344 : vector<8x128xf32>
    %c0_107 = arith.constant 0 : index
    %c0_108 = arith.constant 0 : index
    %346 = vector.load %arg11[%c0_107, %c0_108] : memref<8x128xf32, #tpu.memory_space<vmem>>, vector<8x128xf32>
    tpu.vector_store %arg11[%c0_107, %c0_108], %345 {strides = array<i32>} : memref<8x128xf32, #tpu.memory_space<vmem>>, vector<8x128xf32>,
    return
  }
}

</mosaic_0001>

<bundles_post_ra>
// kernel: tpu_custom_call.1
= control target key start
LH: loop header
LB: loop body
LE: loop exit
PB: predicated region body
PF: predicated region fallthrough
CT: control target
= control target key end

     0   :  { %16 = vsyncpa [#allocation5], 0  ;;  %s2803_s0 = inlined_call_operand.vmem [shape: f32[64,32], index: 0, kind: input, shape index: {}]   ;;  %s2804_s1 = inlined_call_operand.hbm [shape: f32[32,256], index: 1, kind: input, shape index: {}]   ;;  %s2805_s2 = inlined_call_operand.vmem [shape: f32[1,256], index: 2, kind: input, shape index: {}]   ;;  %s2806_s3 = inlined_call_operand.hbm [shape: f32[64,256], index: 3, kind: input, shape index: {}]   ;;  %s2807_s4 = inlined_call_operand.hbm [shape: f32[64,256], index: 4, kind: input, shape index: {}]   ;;  %s2808_s5 = inlined_call_operand.hbm [shape: f32[64,256], index: 5, kind: input, shape index: {}]   ;;  %s2809_s6 = inlined_call_operand.vmem [shape: f32[1,256], index: 6, kind: input, shape index: {}]   ;;  %s2810_s7 = inlined_call_operand.hbm [shape: f32[64,256], index: 7, kind: input, shape index: {}]   ;;  %s2811_s8 = inlined_call_operand.vmem [shape: f32[8,16], index: 8, kind: input, shape index: {}]   ;;  %s2812_s9 = inlined_call_operand.vmem [shape: f32[80,128], index: 9, kind: input, shape index: {}]   ;;  %s2813_s10 = inlined_call_operand.vmem [shape: f32[1,128], index: 10, kind: input, shape index: {}]   ;;  %s2814_s11 = inlined_call_operand.hbm [shape: f32[8,128], index: 11, kind: output, shape index: {}]  }
   0x1   :  { %17 = vsyncpa [#allocation8], 0 }
   0x2   :  { %18 = vsyncpa [#allocation11], 0 }
   0x3   :  { %19 = vsyncpa [#allocation6], 0  ;;  %s41_s19 = sshll.u32 %s2806_s3, 4  ;;  %s2092_s20 = smov [#allocation7]   ;;  %s42_s19 = int_to_ptr.hbm [resolvable:$true] %s41_s19 }
   0x4   :  { %s43_s21 = sshll.u32 %s2092_s20, 4  ;;  %s67_s24 = sshll.u32 %s2808_s5, 4  ;;  %s44_s21 = int_to_ptr.vmem [resolvable:$true] %s43_s21  ;;  %s68_s24 = int_to_ptr.hbm [resolvable:$true] %s67_s24 }
   0x5   :  { %s2093_s25 = smov 256   ;;  %s2094_s26 = smov 16  }
   0x6   :  { %49 = dma.hbm_to_vmem [thread:$0]  %s42_s19, 2048, %s44_s21, [#allocation8], %s2093_s25, %s2093_s25, %s2094_s26  }
   0x7   :  { %s2095_s27 = smov [#allocation10]   ;;  %s26_s12 = sshll.u32 %s2804_s1, 4  ;;  %s27_s12 = int_to_ptr.hbm [resolvable:$true] %s26_s12 }
   0x8   :  { %s69_s28 = sshll.u32 %s2095_s27, 4  ;;  %s54_s14 = sshll.u32 %s2807_s4, 4  ;;  %s70_s28 = int_to_ptr.vmem [resolvable:$true] %s69_s28  ;;  %s55_s14 = int_to_ptr.hbm [resolvable:$true] %s54_s14 }
   0x9   :  { %75 = dma.hbm_to_vmem [thread:$0]  %s68_s24, 2048, %s70_s28, [#allocation11], %s2093_s25, %s2093_s25, %s2094_s26  }
   0xa   :  { %s2096_s15 = smov [#allocation4]   ;;  %s2097_s5 = smov [#allocation9]  }
   0xb   :  { %s28_s16 = sshll.u32 %s2096_s15, 4  ;;  %s56_s17 = sshll.u32 %s2097_s5, 4  ;;  %s29_s16 = int_to_ptr.vmem [resolvable:$true] %s28_s16  ;;  %s57_s17 = int_to_ptr.vmem [resolvable:$true] %s56_s17 }
   0xc   :  { %34 = dma.hbm_to_vmem [thread:$0]  %s27_s12, 1024, %s29_s16, [#allocation5], %s2093_s25, %s2093_s25, %s2094_s26  }
   0xd   :  { %s82_s20 = sshll.u32 %s2810_s7, 4  ;;  %s2098_s1 = smov [#allocation12]   ;;  %s83_s20 = int_to_ptr.hbm [resolvable:$true] %s82_s20 }
   0xe   :  { %62 = dma.hbm_to_vmem [thread:$0]  %s55_s14, 2048, %s57_s17, [#allocation8], %s2093_s25, %s2093_s25, %s2094_s26  }
   0xf   :  { %s84_s21 = sshll.u32 %s2098_s1, 4  ;;  %s85_s21 = int_to_ptr.vmem [resolvable:$true] %s84_s21 }
  0x10   :  { %90 = dma.hbm_to_vmem [thread:$0]  %s83_s20, 2048, %s85_s21, [#allocation11], %s2093_s25, %s2093_s25, %s2094_s26  }
  0x11   :  { %2084 = dma.done.wait [#allocation5], 1024  }
  0x12   :  { %2085 = vsyncadd [#allocation5], 4294966272 }
  0x13   :  { %2086 = dma.done.wait [#allocation8], 4096  }
  0x14   :  { %2087 = vsyncadd [#allocation8], 4294963200 }
  0x15   :  { %2088 = dma.done.wait [#allocation11], 4096  }
  0x16   :  { %2089 = vsyncadd [#allocation11], 4294963200  ;;  %v2177_v0 = vld [vmem:[#allocation7 + $0x78] sm:$0xff]  ;;  %v2179_v1 = vld [vmem:[#allocation7 + $0x68] sm:$0xff]  ;;  %vm139_vm0 = vcmask 261120   ;;  %v2099_v24 = vmov 0.0  }
  0x17   :  { %294 = vmatpush.msra.mxu3 %v2177_v0  ;;  %v2182_v2 = vld [vmem:[#allocation7 + $0x58] sm:$0xff]  ;;  %v130_v4 = vld [vmem:[#allocation4 + $0x28] sm:$0xff]  ;;  %v2187_v7 = vld [vmem:[#allocation7 + $0x70] sm:$0xff]  ;;  %s2100_s24 = smov 64   ;;  %vm262_vm1 = vcmask 523264   ;;  %vm1704_vm2 = vcmask 130048  }
  0x18   :  { %v132_v3 = vld [vmem:[#allocation4 + $0x38] sm:$0xff]  ;;  %v2185_v5 = vld [vmem:[#allocation7 + $0x48] sm:$0xff]  ;;  %v2190_v8 = vld [vmem:[#allocation7 + $0x60] sm:$0xff]  ;;  %274 = vmatpush.msra.mxu2 %v2187_v7  ;;  %s2101_s16 = smov [#allocation13]   ;;  %s1741_s17 = sshll.u32 %s2814_s11, 4  ;;  %s1742_s17 = int_to_ptr.hbm [resolvable:$true] %s1741_s17 }
  0x19   :  { %295 = vmatpush.msra.mxu3 %v2179_v1  ;;  %217 = vmatpush.msra.mxu1 %v132_v3  ;;  %v128_v6 = vld [vmem:[#allocation4 + $0x18] sm:$0xff]  ;;  %v126_v10 = vld [vmem:[#allocation4 + $0x8] sm:$0xff]  ;;  %v131_v11 = vld [vmem:[#allocation4 + $0x30] sm:$0xff]  ;;  %s1739_s5 = sshll.u32 %s2101_s16, 4  ;;  %s1740_s5 = int_to_ptr.vmem [resolvable:$true] %s1739_s5 }
  0x1a   :  { %v2192_v9 = vld [vmem:[#allocation7 + $0x38] sm:$0xff]  ;;  %v117_v12 = vld [vmem:[%s2803_s0] sm:$0xff]  ;;  %v2199_v13 = vld [vmem:[#allocation7 + $0x50] sm:$0xff]  ;;  %275 = vmatpush.msra.mxu2 %v2190_v8  ;;  %176 = vmatpush.msra.mxu0 %v131_v11 }
  0x1b   :  { %296 = vmatpush.msra.mxu3 %v2182_v2  ;;  %218 = vmatpush.msra.mxu1 %v130_v4  ;;  %v2201_v14 = vld [vmem:[#allocation7 + $0x28] sm:$0xff]  ;;  %v129_v15 = vld [vmem:[#allocation4 + $0x20] sm:$0xff]  ;;  %v2207_v17 = vld [vmem:[#allocation7 + $0x18] sm:$0xff] }
  0x1c   :  { %v2205_v16 = vld [vmem:[#allocation7 + $0x40] sm:$0xff]  ;;  %276 = vmatpush.msra.mxu2 %v2199_v13  ;;  %v127_v18 = vld [vmem:[#allocation4 + $0x10] sm:$0xff]  ;;  %177 = vmatpush.msra.mxu0 %v129_v15  ;;  %v2214_v20 = vld [vmem:[#allocation7 + $0x8] sm:$0xff] }
  0x1d   :  { %297 = vmatpush.msra.mxu3 %v2185_v5  ;;  %219 = vmatpush.msra.mxu1 %v128_v6  ;;  %v2212_v19 = vld [vmem:[#allocation7 + $0x30] sm:$0xff]  ;;  %v125_v21 = vld [vmem:[#allocation4] sm:$0xff]  ;;  %v118_v47 = vld [vmem:[%s2803_s0 + $0x8] sm:$0xff] }
  0x1e   :  { %277 = vmatpush.msra.mxu2 %v2205_v16  ;;  %v2219_v22 = vld [vmem:[#allocation7 + $0x20] sm:$0xff]  ;;  %178 = vmatpush.msra.mxu0 %v127_v18  ;;  %v2224_v23 = vld [vmem:[#allocation7 + $0x10] sm:$0xff] }
  0x1f   :  { %298 = vmatpush.msra.mxu3 %v2192_v9  ;;  %220 = vmatpush.msra.mxu1 %v126_v10  ;;  %v2228_v25 = vld [vmem:[#allocation7] sm:$0xff]  ;;  %v119_v15 = vld [vmem:[%s2803_s0 + $0x10] sm:$0xff] }
  0x20   :  { %1761 = vmatmul.msk.f32.vlgmr.msra.gmra.mxu1 %vm139_vm0, %v117_v12  ;;  %278 = vmatpush.msra.mxu2 %v2212_v19  ;;  %v133_v26 = vld [vmem:[%s2805_s2] sm:$0x3] }
  0x21   :  { %299 = vmatpush.msra.mxu3 %v2201_v14  ;;  %574 = vmatpush.msrb.mxu1 %v2177_v0  ;;  %v2299_v27 = vperm.slane %v133_v26, 1  ;;  %v2303_v33 = vperm.slane %v133_v26, 0 }
  0x22   :  { %179 = vmatpush.msra.mxu0 %v125_v21  ;;  %279 = vmatpush.msra.mxu2 %v2219_v22 }
  0x23   :  { %300 = vmatpush.msra.mxu3 %v2207_v17  ;;  %575 = vmatpush.msrb.mxu1 %v2179_v1 }
  0x24   :  { %1753 = vmatmul.msk.f32.vlgmr.msra.gmra.mxu0 %vm139_vm0, %v117_v12  ;;  %280 = vmatpush.msra.mxu2 %v2224_v23 }
  0x25   :  { %301 = vmatpush.msra.mxu3 %v2214_v20  ;;  %576 = vmatpush.msrb.mxu1 %v2182_v2 }
  0x26   :  { %302 = vmatmul.f32.vlgmr.msra.gmra.mxu3 %v2099_v24  ;;  %554 = vmatpush.msrb.mxu0 %v2187_v7 }
  0x27   :  { %364 = vmatpush.msrb.mxu3 %v2177_v0  ;;  %281 = vmatpush.msra.mxu2 %v2228_v25 }
  0x28   :  { %577 = vmatpush.msrb.mxu1 %v2185_v5  ;;  %282 = vmatmul.f32.vlgmr.msra.gmra.mxu2 %v2099_v24 }
  0x29   :  { %365 = vmatpush.msrb.mxu3 %v2179_v1  ;;  %344 = vmatpush.msrb.mxu2 %v2187_v7 }
  0x2a   :  { %578 = vmatpush.msrb.mxu1 %v2192_v9  ;;  %555 = vmatpush.msrb.mxu0 %v2190_v8 }
  0x2b   :  { %366 = vmatpush.msrb.mxu3 %v2182_v2  ;;  %345 = vmatpush.msrb.mxu2 %v2190_v8 }
  0x2c   :  { %579 = vmatpush.msrb.mxu1 %v2201_v14  ;;  %556 = vmatpush.msrb.mxu0 %v2199_v13 }
  0x2d   :  { %367 = vmatpush.msrb.mxu3 %v2185_v5  ;;  %346 = vmatpush.msrb.mxu2 %v2199_v13 }
  0x2e   :  { %580 = vmatpush.msrb.mxu1 %v2207_v17  ;;  %557 = vmatpush.msrb.mxu0 %v2205_v16 }
  0x2f   :  { %368 = vmatpush.msrb.mxu3 %v2192_v9  ;;  %347 = vmatpush.msrb.mxu2 %v2205_v16 }
  0x30   :  { %581 = vmatpush.msrb.mxu1 %v2214_v20  ;;  %558 = vmatpush.msrb.mxu0 %v2212_v19 }
  0x31   :  { %369 = vmatpush.msrb.mxu3 %v2201_v14  ;;  %348 = vmatpush.msrb.mxu2 %v2212_v19 }
  0x32   :  { %714 = vmatpush.msra.mxu1 %v2177_v0  ;;  %559 = vmatpush.msrb.mxu0 %v2219_v22 }
  0x33   :  { %370 = vmatpush.msrb.mxu3 %v2207_v17  ;;  %349 = vmatpush.msrb.mxu2 %v2219_v22 }
  0x34   :  { %560 = vmatpush.msrb.mxu0 %v2224_v23  ;;  %715 = vmatpush.msra.mxu1 %v2179_v1 }
  0x35   :  { %371 = vmatpush.msrb.mxu3 %v2214_v20  ;;  %350 = vmatpush.msrb.mxu2 %v2224_v23 }
  0x36   :  { %561 = vmatpush.msrb.mxu0 %v2228_v25  ;;  %716 = vmatpush.msra.mxu1 %v2182_v2 }
  0x37   :  { %434 = vmatpush.msra.mxu3 %v2177_v0  ;;  %351 = vmatpush.msrb.mxu2 %v2228_v25 }
  0x38   :  { %694 = vmatpush.msra.mxu0 %v2187_v7  ;;  %717 = vmatpush.msra.mxu1 %v2185_v5 }
  0x39   :  { %435 = vmatpush.msra.mxu3 %v2179_v1  ;;  %414 = vmatpush.msra.mxu2 %v2187_v7 }
  0x3a   :  { %695 = vmatpush.msra.mxu0 %v2190_v8  ;;  %718 = vmatpush.msra.mxu1 %v2192_v9 }
  0x3b   :  { %436 = vmatpush.msra.mxu3 %v2182_v2  ;;  %415 = vmatpush.msra.mxu2 %v2190_v8 }
  0x3c   :  { %696 = vmatpush.msra.mxu0 %v2199_v13  ;;  %719 = vmatpush.msra.mxu1 %v2201_v14 }
  0x3d   :  { %437 = vmatpush.msra.mxu3 %v2185_v5  ;;  %416 = vmatpush.msra.mxu2 %v2199_v13 }
  0x3e   :  { %697 = vmatpush.msra.mxu0 %v2205_v16  ;;  %720 = vmatpush.msra.mxu1 %v2207_v17 }
  0x3f   :  { %438 = vmatpush.msra.mxu3 %v2192_v9  ;;  %417 = vmatpush.msra.mxu2 %v2205_v16 }
  0x40   :  { %698 = vmatpush.msra.mxu0 %v2212_v19  ;;  %721 = vmatpush.msra.mxu1 %v2214_v20 }
  0x41   :  { %439 = vmatpush.msra.mxu3 %v2201_v14  ;;  %418 = vmatpush.msra.mxu2 %v2212_v19 }
  0x42   :  { %699 = vmatpush.msra.mxu0 %v2219_v22  ;;  %1762 = vmatmul.msk.f32.gmra.mxu1 %vm139_vm0, %v118_v47 }
  0x43   :  { %440 = vmatpush.msra.mxu3 %v2207_v17  ;;  %419 = vmatpush.msra.mxu2 %v2219_v22 }
  0x44   :  { %700 = vmatpush.msra.mxu0 %v2224_v23 }
  0x45   :  { %441 = vmatpush.msra.mxu3 %v2214_v20  ;;  %420 = vmatpush.msra.mxu2 %v2224_v23 }
  0x46   :  { %701 = vmatpush.msra.mxu0 %v2228_v25 }
  0x47   :  { %421 = vmatpush.msra.mxu2 %v2228_v25  ;;  %1754 = vmatmul.msk.f32.gmra.mxu0 %vm139_vm0, %v118_v47 }
  0x4a   :  { %1763 = vmatmul.msk.f32.gmra.mxu1 %vm139_vm0, %v119_v15 }
  0x4f   :  { %1755 = vmatmul.msk.f32.gmra.mxu0 %vm139_vm0, %v119_v15 }
  0x9d   :  { %v222_v28 = vpop.f32.mrf.mxu1 }
  0x9e   :  { %v223_v29 = vadd.f32 %v222_v28, %v2299_v27 }
  0xa1   :  { %v181_v34 = vpop.f32.mrf.mxu0 }
  0xa2   :  { %v182_v35 = vadd.f32 %v181_v34, %v2303_v33 }
  0xa9   :  { %v303_v30 = vpop.f32.mrf.mxu3 }
  0xaa   :  { %v307_v31 = vadd.f32 %v303_v30, %v223_v29 }
  0xab   :  { %v283_v36 = vpop.f32.mrf.mxu2 }
  0xac   :  { %1842 = vtanh.f32 %v307_v31  ;;  %v306_v37 = vadd.f32 %v283_v36, %v182_v35 }
  0xae   :  { %1844 = vtanh.f32 %v306_v37 }
  0xb2   :  { %v1843_v32 = vpop.eup %1842 }
  0xb3   :  { %316 = vrot.lane.b32.xlu0 %v1843_v32, %s2100_s24  ;;  %v311_v48 = vmul.f32 0.5, %v1843_v32 }
  0xb4   :  { %v1845_v38 = vpop.eup %1844 }
  0xb5   :  { %v310_v39 = vmul.f32 0.5, %v1845_v38  ;;  %v313_v49 = vadd.f32 0.5, %v311_v48  ;;  %v120_v48 = vld [vmem:[%s2803_s0 + $0x18] sm:$0xff] }
  0xb6   :  { %1756 = vmatmul.msk.f32.gmra.mxu0 %vm139_vm0, %v120_v48  ;;  %1764 = vmatmul.msk.f32.gmra.mxu1 %vm139_vm0, %v120_v48 }
  0xb7   :  { %v312_v40 = vadd.f32 0.5, %v310_v39 }
  0xb9   :  { %v314_v43 = vmul.f32 0.0, %v312_v40 }
  0xbf   :  { %v225_v52 = vpop.f32.mrf.mxu1 }
  0xc0   :  { %v226_v53 = vadd.f32 %v225_v52, %v2299_v27 }
  0xc4   :  { %v184_v57 = vpop.f32.mrf.mxu0 }
  0xc5   :  { %v185_v58 = vadd.f32 %v184_v57, %v2303_v33 }
  0xc7   :  { %v228_v29 = vpop.f32.mrf.mxu1 }
  0xc8   :  { %v229_v30 = vadd.f32 %v228_v29, %v2299_v27 }
  0xcc   :  { %v187_v35 = vpop.f32.mrf.mxu0 }
  0xcd   :  { %v188_v36 = vadd.f32 %v187_v35, %v2303_v33 }
 0x125   :  { %v317_v41 = vpop.permute.xlu0 %316 }
 0x126   :  { %v319_v42 = vmul.f32 %v317_v41, %v312_v40 }
 0x128   :  { %321 = vrot.lane.b32.xlu0 %v319_v42, %s2100_s24 }
 0x19a   :  { %v322_v44 = vpop.permute.xlu0 %321 }
 0x19b   :  { %v324_v45 = vadd.f32 %v322_v44, %v314_v43 }
 0x19d   :  { %1846 = vtanh.f32 %v324_v45 }
 0x1a3   :  { %v1847_v46 = vpop.eup %1846 }
 0x1a4   :  { %327 = vrot.lane.b32.xlu1 %v1847_v46, %s2100_s24 }
 0x216   :  { %v328_v50 = vpop.permute.xlu1 %327 }
 0x217   :  { %v330_v51 = vmul.f32 %v328_v50, %v313_v49 }
 0x219   :  { %331 = vst.msk [vmem:[#allocation2] sm:$0xff] %vm262_vm1, %v330_v51  ;;  %1769 = vmatmul.msk.f32.vlgmr.msrb.gmra.mxu2 %vm262_vm1, %v330_v51  ;;  %1770 = vmatmul.msk.f32.vlgmr.msrb.gmra.mxu3 %vm262_vm1, %v330_v51 }
 0x21a   :  { %332 = vst.msk [vmem:[#allocation3 + $0x38] sm:$0xff] %vm262_vm1, %v330_v51  ;;  %484 = vmatpush.msrb.mxu2 %v2187_v7  ;;  %504 = vmatpush.msrb.mxu3 %v2177_v0 }
 0x21c   :  { %485 = vmatpush.msrb.mxu2 %v2190_v8  ;;  %505 = vmatpush.msrb.mxu3 %v2179_v1 }
 0x21e   :  { %486 = vmatpush.msrb.mxu2 %v2199_v13  ;;  %506 = vmatpush.msrb.mxu3 %v2182_v2 }
 0x220   :  { %487 = vmatpush.msrb.mxu2 %v2205_v16  ;;  %507 = vmatpush.msrb.mxu3 %v2185_v5 }
 0x222   :  { %488 = vmatpush.msrb.mxu2 %v2212_v19  ;;  %508 = vmatpush.msrb.mxu3 %v2192_v9 }
 0x224   :  { %489 = vmatpush.msrb.mxu2 %v2219_v22  ;;  %509 = vmatpush.msrb.mxu3 %v2201_v14 }
 0x226   :  { %490 = vmatpush.msrb.mxu2 %v2224_v23  ;;  %510 = vmatpush.msrb.mxu3 %v2207_v17 }
 0x228   :  { %491 = vmatpush.msrb.mxu2 %v2228_v25  ;;  %511 = vmatpush.msrb.mxu3 %v2214_v20 }
 0x29c   :  { %v373_v54 = vpop.f32.mrf.mxu3  ;;  %v353_v59 = vpop.f32.mrf.mxu2 }
 0x29d   :  { %v377_v55 = vadd.f32 %v373_v54, %v226_v53  ;;  %v376_v60 = vadd.f32 %v353_v59, %v185_v58  ;;  %v123_v53 = vld [vmem:[%s2803_s0 + $0x30] sm:$0xff] }
 0x29f   :  { %1848 = vtanh.f32 %v377_v55 }
 0x2a0   :  { %1850 = vtanh.f32 %v376_v60 }
 0x2a5   :  { %v1849_v56 = vpop.eup %1848 }
 0x2a6   :  { %386 = vrot.lane.b32.xlu1 %v1849_v56, %s2100_s24  ;;  %v1851_v61 = vpop.eup %1850  ;;  %v381_v18 = vmul.f32 0.5, %v1849_v56  ;;  %v124_v56 = vld [vmem:[%s2803_s0 + $0x38] sm:$0xff] }
 0x2a7   :  { %v380_v62 = vmul.f32 0.5, %v1851_v61 }
 0x2a8   :  { %v383_v21 = vadd.f32 0.5, %v381_v18 }
 0x2a9   :  { %v382_v63 = vadd.f32 0.5, %v380_v62 }
 0x2ab   :  { %v384_v6 = vmul.f32 %v382_v63, %v324_v45 }
 0x318   :  { %v387_v3 = vpop.permute.xlu1 %386 }
 0x319   :  { %v389_v4 = vmul.f32 %v387_v3, %v382_v63 }
 0x31b   :  { %391 = vrot.lane.b32.xlu2 %v389_v4, %s2100_s24 }
 0x375   :  { %v392_v10 = vpop.permute.xlu2 %391 }
 0x376   :  { %v394_v11 = vadd.f32 %v392_v10, %v384_v6 }
 0x378   :  { %1852 = vtanh.f32 %v394_v11 }
 0x37e   :  { %v1853_v12 = vpop.eup %1852 }
 0x37f   :  { %397 = vrot.lane.b32.xlu2 %v1853_v12, %s2100_s24 }
 0x3d9   :  { %v398_v26 = vpop.permute.xlu2 %397 }
 0x3da   :  { %v400_v28 = vmul.f32 %v398_v26, %v383_v21 }
 0x3dc   :  { %401 = vst.msk [vmem:[#allocation2 + $0x8] sm:$0xff] %vm262_vm1, %v400_v28  ;;  %1771 = vmatmul.msk.f32.vlgmr.msra.gmra.mxu2 %vm262_vm1, %v400_v28  ;;  %1772 = vmatmul.msk.f32.vlgmr.msra.gmra.mxu3 %vm262_vm1, %v400_v28 }
 0x3dd   :  { %402 = vst.msk [vmem:[#allocation3 + $0x30] sm:$0xff] %vm262_vm1, %v400_v28  ;;  %624 = vmatpush.msra.mxu2 %v2187_v7  ;;  %644 = vmatpush.msra.mxu3 %v2177_v0 }
 0x3df   :  { %625 = vmatpush.msra.mxu2 %v2190_v8  ;;  %645 = vmatpush.msra.mxu3 %v2179_v1 }
 0x3e1   :  { %626 = vmatpush.msra.mxu2 %v2199_v13  ;;  %646 = vmatpush.msra.mxu3 %v2182_v2 }
 0x3e3   :  { %627 = vmatpush.msra.mxu2 %v2205_v16  ;;  %647 = vmatpush.msra.mxu3 %v2185_v5 }
 0x3e5   :  { %628 = vmatpush.msra.mxu2 %v2212_v19  ;;  %648 = vmatpush.msra.mxu3 %v2192_v9 }
 0x3e7   :  { %629 = vmatpush.msra.mxu2 %v2219_v22  ;;  %649 = vmatpush.msra.mxu3 %v2201_v14 }
 0x3e9   :  { %630 = vmatpush.msra.mxu2 %v2224_v23  ;;  %650 = vmatpush.msra.mxu3 %v2207_v17 }
 0x3eb   :  { %631 = vmatpush.msra.mxu2 %v2228_v25  ;;  %651 = vmatpush.msra.mxu3 %v2214_v20 }
 0x45f   :  { %v443_v31 = vpop.f32.mrf.mxu3  ;;  %v423_v37 = vpop.f32.mrf.mxu2 }
 0x460   :  { %v447_v32 = vadd.f32 %v443_v31, %v229_v30  ;;  %v446_v38 = vadd.f32 %v423_v37, %v188_v36 }
 0x462   :  { %1854 = vtanh.f32 %v447_v32 }
 0x463   :  { %1856 = vtanh.f32 %v446_v38 }
 0x468   :  { %v1855_v34 = vpop.eup %1854 }
 0x469   :  { %456 = vrot.lane.b32.xlu0 %v1855_v34, %s2100_s24  ;;  %v1857_v39 = vpop.eup %1856  ;;  %v451_v49 = vmul.f32 0.5, %v1855_v34 }
 0x46a   :  { %v450_v40 = vmul.f32 0.5, %v1857_v39 }
 0x46b   :  { %v453_v50 = vadd.f32 0.5, %v451_v49 }
 0x46c   :  { %v452_v41 = vadd.f32 0.5, %v450_v40 }
 0x46e   :  { %v454_v44 = vmul.f32 %v452_v41, %v394_v11 }
 0x4db   :  { %v457_v42 = vpop.permute.xlu0 %456 }
 0x4dc   :  { %v459_v43 = vmul.f32 %v457_v42, %v452_v41 }
 0x4de   :  { %461 = vrot.lane.b32.xlu1 %v459_v43, %s2100_s24 }
 0x550   :  { %v462_v45 = vpop.permute.xlu1 %461 }
 0x551   :  { %v464_v46 = vadd.f32 %v462_v45, %v454_v44 }
 0x553   :  { %1858 = vtanh.f32 %v464_v46 }
 0x559   :  { %v1859_v47 = vpop.eup %1858 }
 0x55a   :  { %467 = vrot.lane.b32.xlu2 %v1859_v47, %s2100_s24 }
 0x5b4   :  { %v468_v51 = vpop.permute.xlu2 %467 }
 0x5b5   :  { %v470_v52 = vmul.f32 %v468_v51, %v453_v50 }
 0x5b7   :  { %471 = vst.msk [vmem:[#allocation2 + $0x10] sm:$0xff] %vm262_vm1, %v470_v52  ;;  %1773 = vmatmul.msk.f32.vlgmr.msrb.gmra.mxu2 %vm262_vm1, %v470_v52  ;;  %1774 = vmatmul.msk.f32.vlgmr.msrb.gmra.mxu3 %vm262_vm1, %v470_v52 }
 0x5b8   :  { %472 = vst.msk [vmem:[#allocation3 + $0x28] sm:$0xff] %vm262_vm1, %v470_v52  ;;  %764 = vmatpush.msrb.mxu2 %v2187_v7  ;;  %784 = vmatpush.msrb.mxu3 %v2177_v0  ;;  %v231_v0 = vpop.f32.mrf.mxu1 }
 0x5ba   :  { %765 = vmatpush.msrb.mxu2 %v2190_v8  ;;  %785 = vmatpush.msrb.mxu3 %v2179_v1  ;;  %v232_v1 = vadd.f32 %v231_v0, %v2299_v27  ;;  %v190_v8 = vpop.f32.mrf.mxu0 }
 0x5bc   :  { %766 = vmatpush.msrb.mxu2 %v2199_v13  ;;  %786 = vmatpush.msrb.mxu3 %v2182_v2 }
 0x5be   :  { %767 = vmatpush.msrb.mxu2 %v2205_v16  ;;  %787 = vmatpush.msrb.mxu3 %v2185_v5 }
 0x5c0   :  { %768 = vmatpush.msrb.mxu2 %v2212_v19  ;;  %788 = vmatpush.msrb.mxu3 %v2192_v9  ;;  %v191_v9 = vadd.f32 %v190_v8, %v2303_v33 }
 0x5c2   :  { %769 = vmatpush.msrb.mxu2 %v2219_v22  ;;  %789 = vmatpush.msrb.mxu3 %v2201_v14 }
 0x5c4   :  { %770 = vmatpush.msrb.mxu2 %v2224_v23  ;;  %790 = vmatpush.msrb.mxu3 %v2207_v17  ;;  %v121_v23 = vld [vmem:[%s2803_s0 + $0x20] sm:$0xff] }
 0x5c5   :  { %1757 = vmatmul.msk.f32.gmra.mxu0 %vm139_vm0, %v121_v23  ;;  %1765 = vmatmul.msk.f32.gmra.mxu1 %vm139_vm0, %v121_v23 }
 0x5c6   :  { %771 = vmatpush.msrb.mxu2 %v2228_v25  ;;  %791 = vmatpush.msrb.mxu3 %v2214_v20  ;;  %v122_v25 = vld [vmem:[%s2803_s0 + $0x28] sm:$0xff] }
 0x5cd   :  { %1758 = vmatmul.msk.f32.gmra.mxu0 %vm139_vm0, %v122_v25  ;;  %1766 = vmatmul.msk.f32.gmra.mxu1 %vm139_vm0, %v122_v25 }
 0x5d5   :  { %1759 = vmatmul.msk.f32.gmra.mxu0 %vm139_vm0, %v123_v53  ;;  %1767 = vmatmul.msk.f32.gmra.mxu1 %vm139_vm0, %v123_v53 }
 0x5dd   :  { %1760 = vmatmul.msk.f32.gmra.mxu0 %vm139_vm0, %v124_v56  ;;  %1768 = vmatmul.msk.f32.gmra.mxu1 %vm139_vm0, %v124_v56 }
 0x63a   :  { %v513_v2 = vpop.f32.mrf.mxu3  ;;  %v493_v13 = vpop.f32.mrf.mxu2 }
 0x63b   :  { %v517_v5 = vadd.f32 %v513_v2, %v232_v1  ;;  %v516_v14 = vadd.f32 %v493_v13, %v191_v9 }
 0x63d   :  { %1860 = vtanh.f32 %v517_v5 }
 0x63e   :  { %1862 = vtanh.f32 %v516_v14 }
 0x642   :  { %v234_v63 = vpop.f32.mrf.mxu1  ;;  %v193_v18 = vpop.f32.mrf.mxu0 }
 0x643   :  { %v1861_v7 = vpop.eup %1860  ;;  %v235_v10 = vadd.f32 %v234_v63, %v2299_v27  ;;  %v194_v29 = vadd.f32 %v193_v18, %v2303_v33  ;;  %v846_v63 = vld [vmem:[#allocation9 + $0x78] sm:$0xff] }
 0x644   :  { %526 = vrot.lane.b32.xlu0 %v1861_v7, %s2100_s24  ;;  %v1863_v16 = vpop.eup %1862  ;;  %v521_v59 = vmul.f32 0.5, %v1861_v7 }
 0x645   :  { %v520_v17 = vmul.f32 0.5, %v1863_v16 }
 0x646   :  { %v523_v60 = vadd.f32 0.5, %v521_v59 }
 0x647   :  { %v522_v19 = vadd.f32 0.5, %v520_v17 }
 0x649   :  { %v524_v54 = vmul.f32 %v522_v19, %v464_v46 }
 0x64a   :  { %v237_v3 = vpop.f32.mrf.mxu1  ;;  %v196_v21 = vpop.f32.mrf.mxu0 }
 0x64b   :  { %v238_v46 = vadd.f32 %v237_v3, %v2299_v27  ;;  %v197_v51 = vadd.f32 %v196_v21, %v2303_v33  ;;  %v843_v3 = vld [vmem:[#allocation9 + $0x60] sm:$0xff] }
 0x652   :  { %v2422_v4 = vpop.f32.mrf.mxu1  ;;  %v2428_v26 = vpop.f32.mrf.mxu0 }
 0x65a   :  { %v2424_v6 = vpop.f32.mrf.mxu1  ;;  %v2430_v28 = vpop.f32.mrf.mxu0 }
 0x6b6   :  { %v527_v22 = vpop.permute.xlu0 %526 }
 0x6b7   :  { %v529_v20 = vmul.f32 %v527_v22, %v522_v19 }
 0x6b9   :  { %531 = vrot.lane.b32.xlu1 %v529_v20, %s2100_s24  ;;  %v241_v20 = vadd.f32 %v2422_v4, %v2299_v27  ;;  %v844_v4 = vld [vmem:[#allocation9 + $0x68] sm:$0xff] }
 0x72b   :  { %v532_v55 = vpop.permute.xlu1 %531 }
 0x72c   :  { %v534_v57 = vadd.f32 %v532_v55, %v524_v54  ;;  %v200_v55 = vadd.f32 %v2428_v26, %v2303_v33  ;;  %v839_v26 = vld [vmem:[#allocation9 + $0x40] sm:$0xff] }
 0x72e   :  { %1864 = vtanh.f32 %v534_v57 }
 0x734   :  { %v1865_v58 = vpop.eup %1864 }
 0x735   :  { %537 = vrot.lane.b32.xlu2 %v1865_v58, %s2100_s24 }
 0x78f   :  { %v538_v61 = vpop.permute.xlu2 %537 }
 0x790   :  { %v540_v62 = vmul.f32 %v538_v61, %v523_v60 }
 0x792   :  { %541 = vst.msk [vmem:[#allocation2 + $0x18] sm:$0xff] %vm262_vm1, %v540_v62  ;;  %1775 = vmatmul.msk.f32.vlgmr.msrb.gmra.mxu0 %vm262_vm1, %v540_v62  ;;  %1776 = vmatmul.msk.f32.vlgmr.msrb.gmra.mxu1 %vm262_vm1, %v540_v62 }
 0x793   :  { %542 = vst.msk [vmem:[#allocation3 + $0x20] sm:$0xff] %vm262_vm1, %v540_v62  ;;  %v845_v62 = vld [vmem:[#allocation9 + $0x70] sm:$0xff] }
 0x80f   :  { %v583_v11 = vpop.f32.mrf.mxu1  ;;  %v563_v30 = vpop.f32.mrf.mxu0 }
 0x810   :  { %v587_v12 = vadd.f32 %v583_v11, %v235_v10  ;;  %v586_v31 = vadd.f32 %v563_v30, %v194_v29  ;;  %v841_v10 = vld [vmem:[#allocation9 + $0x50] sm:$0xff]  ;;  %v842_v11 = vld [vmem:[#allocation9 + $0x58] sm:$0xff]  ;;  %v840_v29 = vld [vmem:[#allocation9 + $0x48] sm:$0xff] }
 0x811   :  { %v837_v30 = vld [vmem:[#allocation9 + $0x30] sm:$0xff] }
 0x812   :  { %1866 = vtanh.f32 %v587_v12 }
 0x813   :  { %1868 = vtanh.f32 %v586_v31  ;;  %v838_v31 = vld [vmem:[#allocation9 + $0x38] sm:$0xff] }
 0x818   :  { %v1867_v15 = vpop.eup %1866 }
 0x819   :  { %596 = vrot.lane.b32.xlu0 %v1867_v15, %s2100_s24  ;;  %v1869_v32 = vpop.eup %1868  ;;  %v591_v42 = vmul.f32 0.5, %v1867_v15 }
 0x81a   :  { %v590_v34 = vmul.f32 0.5, %v1869_v32  ;;  %v835_v32 = vld [vmem:[#allocation9 + $0x20] sm:$0xff] }
 0x81b   :  { %v593_v43 = vadd.f32 0.5, %v591_v42 }
 0x81c   :  { %v592_v35 = vadd.f32 0.5, %v590_v34  ;;  %v836_v34 = vld [vmem:[#allocation9 + $0x28] sm:$0xff] }
 0x81e   :  { %v594_v38 = vmul.f32 %v592_v35, %v534_v57 }
 0x88b   :  { %v597_v36 = vpop.permute.xlu0 %596 }
 0x88c   :  { %v599_v37 = vmul.f32 %v597_v36, %v592_v35  ;;  %v833_v35 = vld [vmem:[#allocation9 + $0x10] sm:$0xff]  ;;  %v834_v36 = vld [vmem:[#allocation9 + $0x18] sm:$0xff] }
 0x88e   :  { %601 = vrot.lane.b32.xlu1 %v599_v37, %s2100_s24  ;;  %v831_v37 = vld [vmem:[#allocation9] sm:$0xff] }
 0x900   :  { %v602_v39 = vpop.permute.xlu1 %601 }
 0x901   :  { %v604_v40 = vadd.f32 %v602_v39, %v594_v38  ;;  %v832_v38 = vld [vmem:[#allocation9 + $0x8] sm:$0xff] }
 0x903   :  { %1870 = vtanh.f32 %v604_v40 }
 0x909   :  { %v1871_v41 = vpop.eup %1870 }
 0x90a   :  { %607 = vrot.lane.b32.xlu2 %v1871_v41, %s2100_s24 }
 0x964   :  { %v608_v44 = vpop.permute.xlu2 %607 }
 0x965   :  { %v610_v45 = vmul.f32 %v608_v44, %v593_v43  ;;  %v823_v43 = vld [vmem:[#allocation2] sm:$0xff]  ;;  %v824_v44 = vld [vmem:[#allocation2 + $0x8] sm:$0xff] }
 0x967   :  { %611 = vst.msk [vmem:[#allocation2 + $0x20] sm:$0xff] %vm262_vm1, %v610_v45  ;;  %1777 = vmatmul.msk.f32.vlgmr.msra.gmra.mxu2 %vm262_vm1, %v610_v45  ;;  %1778 = vmatmul.msk.f32.vlgmr.msra.gmra.mxu3 %vm262_vm1, %v610_v45 }
 0x968   :  { %612 = vst.msk [vmem:[#allocation3 + $0x18] sm:$0xff] %vm262_vm1, %v610_v45  ;;  %1009 = vmatpush.msra.mxu2 %v845_v62  ;;  %1050 = vmatpush.msra.mxu3 %v846_v63  ;;  %v825_v45 = vld [vmem:[#allocation2 + $0x10] sm:$0xff]  ;;  %v2484_v62 = vld [vmem:[#allocation12 + $0x78] sm:$0xff]  ;;  %v2488_v63 = vld [vmem:[#allocation12 + $0x68] sm:$0xff] }
 0x96a   :  { %1010 = vmatpush.msra.mxu2 %v843_v3  ;;  %1051 = vmatpush.msra.mxu3 %v844_v4  ;;  %v2492_v4 = vld [vmem:[#allocation12 + $0x58] sm:$0xff] }
 0x96c   :  { %1011 = vmatpush.msra.mxu2 %v841_v10  ;;  %1052 = vmatpush.msra.mxu3 %v842_v11 }
 0x96e   :  { %1012 = vmatpush.msra.mxu2 %v839_v26  ;;  %1053 = vmatpush.msra.mxu3 %v840_v29  ;;  %v2506_v26 = vld [vmem:[#allocation12 + $0x38] sm:$0xff] }
 0x970   :  { %1013 = vmatpush.msra.mxu2 %v837_v30  ;;  %1054 = vmatpush.msra.mxu3 %v838_v31  ;;  %v2512_v30 = vld [vmem:[#allocation12 + $0x28] sm:$0xff] }
 0x972   :  { %1014 = vmatpush.msra.mxu2 %v835_v32  ;;  %1055 = vmatpush.msra.mxu3 %v836_v34  ;;  %v2518_v32 = vld [vmem:[#allocation12 + $0x18] sm:$0xff]  ;;  %v2520_v34 = vld [vmem:[#allocation12 + $0x70] sm:$0xff] }
 0x974   :  { %1015 = vmatpush.msra.mxu2 %v833_v35  ;;  %1056 = vmatpush.msra.mxu3 %v834_v36  ;;  %v2522_v35 = vld [vmem:[#allocation12 + $0x60] sm:$0xff]  ;;  %v2526_v36 = vld [vmem:[#allocation12 + $0x50] sm:$0xff] }
 0x976   :  { %1016 = vmatpush.msra.mxu2 %v831_v37  ;;  %1057 = vmatpush.msra.mxu3 %v832_v38  ;;  %v2531_v37 = vld [vmem:[#allocation12 + $0x40] sm:$0xff]  ;;  %v850_v38 = vld [vmem:[#allocation3 + $0x18] sm:$0xff] }
 0x9ea   :  { %v653_v47 = vpop.f32.mrf.mxu3  ;;  %v633_v50 = vpop.f32.mrf.mxu2 }
 0x9eb   :  { %v657_v48 = vadd.f32 %v653_v47, %v238_v46  ;;  %v656_v52 = vadd.f32 %v633_v50, %v197_v51  ;;  %v826_v46 = vld [vmem:[#allocation2 + $0x18] sm:$0xff]  ;;  %v827_v47 = vld [vmem:[#allocation2 + $0x20] sm:$0xff]  ;;  %v244_v50 = vadd.f32 %v2424_v6, %v2299_v27  ;;  %v869_v27 = vld [vmem:[#allocation10 + $0x70] sm:$0xff] }
 0x9ec   :  { %v870_v6 = vld [vmem:[#allocation10 + $0x78] sm:$0xff]  ;;  %903 = vmatpush.msrb.mxu0 %v869_v27 }
 0x9ed   :  { %1872 = vtanh.f32 %v657_v48  ;;  %944 = vmatpush.msrb.mxu1 %v870_v6 }
 0x9ee   :  { %1874 = vtanh.f32 %v656_v52 }
 0x9f3   :  { %v1873_v49 = vpop.eup %1872 }
 0x9f4   :  { %666 = vrot.lane.b32.xlu0 %v1873_v49, %s2100_s24  ;;  %v1875_v0 = vpop.eup %1874  ;;  %v661_v16 = vmul.f32 0.5, %v1873_v49 }
 0x9f5   :  { %v660_v1 = vmul.f32 0.5, %v1875_v0 }
 0x9f6   :  { %v663_v17 = vadd.f32 0.5, %v661_v16  ;;  %v867_v16 = vld [vmem:[#allocation10 + $0x60] sm:$0xff] }
 0x9f7   :  { %v662_v2 = vadd.f32 0.5, %v660_v1  ;;  %904 = vmatpush.msrb.mxu0 %v867_v16 }
 0x9f9   :  { %v664_v8 = vmul.f32 %v662_v2, %v604_v40 }
 0xa66   :  { %v667_v5 = vpop.permute.xlu0 %666 }
 0xa67   :  { %v669_v7 = vmul.f32 %v667_v5, %v662_v2  ;;  %v203_v2 = vadd.f32 %v2430_v28, %v2303_v33 }
 0xa69   :  { %671 = vrot.lane.b32.xlu1 %v669_v7, %s2100_s24 }
 0xadb   :  { %v672_v9 = vpop.permute.xlu1 %671 }
 0xadc   :  { %v674_v13 = vadd.f32 %v672_v9, %v664_v8 }
 0xade   :  { %1876 = vtanh.f32 %v674_v13 }
 0xae4   :  { %v1877_v14 = vpop.eup %1876 }
 0xae5   :  { %677 = vrot.lane.b32.xlu2 %v1877_v14, %s2100_s24 }
 0xb3f   :  { %v678_v19 = vpop.permute.xlu2 %677 }
 0xb40   :  { %v680_v22 = vmul.f32 %v678_v19, %v663_v17  ;;  %v868_v17 = vld [vmem:[#allocation10 + $0x68] sm:$0xff]  ;;  %v865_v19 = vld [vmem:[#allocation10 + $0x50] sm:$0xff] }
 0xb41   :  { %945 = vmatpush.msrb.mxu1 %v868_v17  ;;  %905 = vmatpush.msrb.mxu0 %v865_v19 }
 0xb42   :  { %681 = vst.msk [vmem:[#allocation2 + $0x28] sm:$0xff] %vm262_vm1, %v680_v22  ;;  %1779 = vmatmul.msk.f32.vlgmr.msra.gmra.mxu0 %vm262_vm1, %v680_v22  ;;  %1780 = vmatmul.msk.f32.vlgmr.msra.gmra.mxu1 %vm262_vm1, %v680_v22 }
 0xb43   :  { %682 = vst.msk [vmem:[#allocation3 + $0x10] sm:$0xff] %vm262_vm1, %v680_v22  ;;  %v866_v22 = vld [vmem:[#allocation10 + $0x58] sm:$0xff] }
 0xb44   :  { %946 = vmatpush.msrb.mxu1 %v866_v22 }
 0xb49   :  { %v828_v48 = vld [vmem:[#allocation2 + $0x28] sm:$0xff] }
 0xb4a   :  { %v849_v31 = vld [vmem:[#allocation3 + $0x10] sm:$0xff] }
 0xbbf   :  { %v723_v23 = vpop.f32.mrf.mxu1  ;;  %v703_v54 = vpop.f32.mrf.mxu0 }
 0xbc0   :  { %v727_v25 = vadd.f32 %v723_v23, %v241_v20  ;;  %v726_v56 = vadd.f32 %v703_v54, %v200_v55  ;;  %v861_v54 = vld [vmem:[#allocation10 + $0x30] sm:$0xff]  ;;  %v862_v55 = vld [vmem:[#allocation10 + $0x38] sm:$0xff] }
 0xbc2   :  { %1878 = vtanh.f32 %v727_v25  ;;  %v863_v25 = vld [vmem:[#allocation10 + $0x40] sm:$0xff] }
 0xbc3   :  { %1880 = vtanh.f32 %v726_v56  ;;  %906 = vmatpush.msrb.mxu0 %v863_v25  ;;  %v859_v56 = vld [vmem:[#allocation10 + $0x20] sm:$0xff] }
 0xbc5   :  { %907 = vmatpush.msrb.mxu0 %v861_v54 }
 0xbc7   :  { %908 = vmatpush.msrb.mxu0 %v859_v56 }
 0xbc8   :  { %v1879_v53 = vpop.eup %1878 }
 0xbc9   :  { %736 = vrot.lane.b32.xlu0 %v1879_v53, %s2100_s24  ;;  %v1881_v57 = vpop.eup %1880  ;;  %v731_v39 = vmul.f32 0.5, %v1879_v53  ;;  %v864_v53 = vld [vmem:[#allocation10 + $0x48] sm:$0xff] }
 0xbca   :  { %v730_v58 = vmul.f32 0.5, %v1881_v57  ;;  %947 = vmatpush.msrb.mxu1 %v864_v53  ;;  %v860_v57 = vld [vmem:[#allocation10 + $0x28] sm:$0xff] }
 0xbcb   :  { %v733_v40 = vadd.f32 0.5, %v731_v39  ;;  %v2539_v39 = vld [vmem:[#allocation12 + $0x8] sm:$0xff] }
 0xbcc   :  { %v732_v59 = vadd.f32 0.5, %v730_v58  ;;  %948 = vmatpush.msrb.mxu1 %v862_v55  ;;  %v857_v58 = vld [vmem:[#allocation10 + $0x10] sm:$0xff] }
 0xbcd   :  { %909 = vmatpush.msrb.mxu0 %v857_v58 }
 0xbce   :  { %v734_v12 = vmul.f32 %v732_v59, %v674_v13  ;;  %949 = vmatpush.msrb.mxu1 %v860_v57 }
 0xc3b   :  { %v737_v60 = vpop.permute.xlu0 %736 }
 0xc3c   :  { %v739_v61 = vmul.f32 %v737_v60, %v732_v59  ;;  %v858_v59 = vld [vmem:[#allocation10 + $0x18] sm:$0xff]  ;;  %v855_v60 = vld [vmem:[#allocation10] sm:$0xff] }
 0xc3d   :  { %950 = vmatpush.msrb.mxu1 %v858_v59  ;;  %910 = vmatpush.msrb.mxu0 %v855_v60 }
 0xc3e   :  { %741 = vrot.lane.b32.xlu1 %v739_v61, %s2100_s24  ;;  %v856_v61 = vld [vmem:[#allocation10 + $0x8] sm:$0xff] }
 0xc3f   :  { %951 = vmatpush.msrb.mxu1 %v856_v61  ;;  %1129 = vmatpush.msra.mxu0 %v2520_v34 }
 0xc41   :  { %1149 = vmatpush.msra.mxu1 %v2484_v62  ;;  %1130 = vmatpush.msra.mxu0 %v2522_v35 }
 0xc43   :  { %1150 = vmatpush.msra.mxu1 %v2488_v63  ;;  %1131 = vmatpush.msra.mxu0 %v2526_v36 }
 0xc45   :  { %1151 = vmatpush.msra.mxu1 %v2492_v4  ;;  %1132 = vmatpush.msra.mxu0 %v2531_v37 }
 0xcb0   :  { %v742_v15 = vpop.permute.xlu1 %741 }
 0xcb1   :  { %v2454_v18 = vadd.f32 %v742_v15, %v734_v12  ;;  %v2498_v15 = vld [vmem:[#allocation12 + $0x48] sm:$0xff] }
 0xcb2   :  { %1152 = vmatpush.msra.mxu1 %v2498_v15 }
 0xcb3   :  { %1882 = vtanh.f32 %v2454_v18 }
 0xcb4   :  { %1153 = vmatpush.msra.mxu1 %v2506_v26 }
 0xcb6   :  { %1154 = vmatpush.msra.mxu1 %v2512_v30 }
 0xcb8   :  { %1155 = vmatpush.msra.mxu1 %v2518_v32 }
 0xcb9   :  { %v1883_v21 = vpop.eup %1882 }
 0xcba   :  { %747 = vrot.lane.b32.xlu2 %v1883_v21, %s2100_s24  ;;  %1156 = vmatpush.msra.mxu1 %v2539_v39 }
 0xd14   :  { %v748_v41 = vpop.permute.xlu2 %747 }
 0xd15   :  { %v750_v42 = vmul.f32 %v748_v41, %v733_v40  ;;  %v2541_v40 = vld [vmem:[#allocation12 + $0x30] sm:$0xff]  ;;  %v2543_v41 = vld [vmem:[#allocation12 + $0x20] sm:$0xff] }
 0xd16   :  { %1133 = vmatpush.msra.mxu0 %v2541_v40 }
 0xd17   :  { %751 = vst.msk [vmem:[#allocation2 + $0x30] sm:$0xff] %vm262_vm1, %v750_v42  ;;  %1781 = vmatmul.msk.f32.vlgmr.msrb.gmra.mxu2 %vm262_vm1, %v750_v42  ;;  %1782 = vmatmul.msk.f32.vlgmr.msrb.gmra.mxu3 %vm262_vm1, %v750_v42 }
 0xd18   :  { %752 = vst.msk [vmem:[#allocation3 + $0x8] sm:$0xff] %vm262_vm1, %v750_v42  ;;  %1217 = vmatpush.msrb.mxu3 %v2484_v62  ;;  %1197 = vmatpush.msrb.mxu2 %v2520_v34  ;;  %v2547_v42 = vld [vmem:[#allocation12 + $0x10] sm:$0xff] }
 0xd19   :  { %1134 = vmatpush.msra.mxu0 %v2543_v41 }
 0xd1a   :  { %1218 = vmatpush.msrb.mxu3 %v2488_v63  ;;  %1198 = vmatpush.msrb.mxu2 %v2522_v35 }
 0xd1b   :  { %1135 = vmatpush.msra.mxu0 %v2547_v42 }
 0xd1c   :  { %1219 = vmatpush.msrb.mxu3 %v2492_v4  ;;  %1199 = vmatpush.msrb.mxu2 %v2526_v36 }
 0xd1e   :  { %v829_v49 = vld [vmem:[#allocation2 + $0x30] sm:$0xff]  ;;  %1220 = vmatpush.msrb.mxu3 %v2498_v15  ;;  %1200 = vmatpush.msrb.mxu2 %v2531_v37 }
 0xd1f   :  { %1799 = vmatmul.msk.f32.vlgmr.msra.gmra.mxu2 %vm262_vm1, %v823_v43  ;;  %1807 = vmatmul.msk.f32.vlgmr.msra.gmra.mxu3 %vm262_vm1, %v823_v43  ;;  %v848_v29 = vld [vmem:[#allocation3 + $0x8] sm:$0xff]  ;;  %v2553_v43 = vld [vmem:[#allocation12] sm:$0xff] }
 0xd20   :  { %1221 = vmatpush.msrb.mxu3 %v2506_v26  ;;  %1201 = vmatpush.msrb.mxu2 %v2541_v40 }
 0xd21   :  { %1136 = vmatpush.msra.mxu0 %v2553_v43 }
 0xd22   :  { %1222 = vmatpush.msrb.mxu3 %v2512_v30  ;;  %1202 = vmatpush.msrb.mxu2 %v2543_v41 }
 0xd24   :  { %1223 = vmatpush.msrb.mxu3 %v2518_v32  ;;  %1203 = vmatpush.msrb.mxu2 %v2547_v42 }
 0xd26   :  { %1224 = vmatpush.msrb.mxu3 %v2539_v39  ;;  %1204 = vmatpush.msrb.mxu2 %v2553_v43 }
 0xd27   :  { %1800 = vmatmul.msk.f32.gmra.mxu2 %vm262_vm1, %v824_v44  ;;  %1808 = vmatmul.msk.f32.gmra.mxu3 %vm262_vm1, %v824_v44  ;;  %v851_v44 = vld [vmem:[#allocation3 + $0x20] sm:$0xff] }
 0xd28   :  { %1355 = vmatpush.msra.mxu3 %v2484_v62  ;;  %1335 = vmatpush.msra.mxu2 %v2520_v34 }
 0xd2a   :  { %1356 = vmatpush.msra.mxu3 %v2488_v63  ;;  %1336 = vmatpush.msra.mxu2 %v2522_v35 }
 0xd2c   :  { %1357 = vmatpush.msra.mxu3 %v2492_v4  ;;  %1337 = vmatpush.msra.mxu2 %v2526_v36 }
 0xd2e   :  { %1358 = vmatpush.msra.mxu3 %v2498_v15  ;;  %1338 = vmatpush.msra.mxu2 %v2531_v37 }
 0xd2f   :  { %1801 = vmatmul.msk.f32.gmra.mxu2 %vm262_vm1, %v825_v45  ;;  %1809 = vmatmul.msk.f32.gmra.mxu3 %vm262_vm1, %v825_v45  ;;  %v852_v45 = vld [vmem:[#allocation3 + $0x28] sm:$0xff] }
 0xd30   :  { %1359 = vmatpush.msra.mxu3 %v2506_v26  ;;  %1339 = vmatpush.msra.mxu2 %v2541_v40 }
 0xd32   :  { %1360 = vmatpush.msra.mxu3 %v2512_v30  ;;  %1340 = vmatpush.msra.mxu2 %v2543_v41 }
 0xd34   :  { %1361 = vmatpush.msra.mxu3 %v2518_v32  ;;  %1341 = vmatpush.msra.mxu2 %v2547_v42 }
 0xd36   :  { %1362 = vmatpush.msra.mxu3 %v2539_v39  ;;  %1342 = vmatpush.msra.mxu2 %v2553_v43 }
 0xd37   :  { %1802 = vmatmul.msk.f32.gmra.mxu2 %vm262_vm1, %v826_v46  ;;  %1810 = vmatmul.msk.f32.gmra.mxu3 %vm262_vm1, %v826_v46  ;;  %v853_v46 = vld [vmem:[#allocation3 + $0x30] sm:$0xff] }
 0xd3f   :  { %1803 = vmatmul.msk.f32.gmra.mxu2 %vm262_vm1, %v827_v47  ;;  %1811 = vmatmul.msk.f32.gmra.mxu3 %vm262_vm1, %v827_v47  ;;  %v854_v47 = vld [vmem:[#allocation3 + $0x38] sm:$0xff] }
 0xd47   :  { %1804 = vmatmul.msk.f32.gmra.mxu2 %vm262_vm1, %v828_v48  ;;  %1812 = vmatmul.msk.f32.gmra.mxu3 %vm262_vm1, %v828_v48 }
 0xd4f   :  { %1805 = vmatmul.msk.f32.gmra.mxu2 %vm262_vm1, %v829_v49  ;;  %1813 = vmatmul.msk.f32.gmra.mxu3 %vm262_vm1, %v829_v49 }
 0xd9a   :  { %v793_v51 = vpop.f32.mrf.mxu3  ;;  %v773_v1 = vpop.f32.mrf.mxu2 }
 0xd9b   :  { %v797_v52 = vadd.f32 %v793_v51, %v244_v50  ;;  %v796_v5 = vadd.f32 %v773_v1, %v203_v2 }
 0xd9d   :  { %1884 = vtanh.f32 %v797_v52 }
 0xd9e   :  { %1886 = vtanh.f32 %v796_v5 }
 0xda2   :  { %v1059_v48 = vpop.f32.mrf.mxu3 }
 0xda3   :  { %v1885_v0 = vpop.eup %1884 }
 0xda4   :  { %806 = vrot.lane.b32.xlu0 %v1885_v0, %s2100_s24  ;;  %v1887_v7 = vpop.eup %1886  ;;  %v801_v3 = vmul.f32 0.5, %v1885_v0  ;;  %v1083_v0 = vld [vmem:[%s2809_s6] sm:$0x3] }
 0xda5   :  { %v800_v8 = vmul.f32 0.5, %v1887_v7 }
 0xda6   :  { %v803_v10 = vadd.f32 0.5, %v801_v3 }
 0xda7   :  { %v802_v9 = vadd.f32 0.5, %v800_v8 }
 0xda9   :  { %v804_v33 = vmul.f32 %v802_v9, %v2454_v18 }
 0xdaa   :  { %v1062_v50 = vpop.f32.mrf.mxu3 }
 0xdb2   :  { %v1065_v2 = vpop.f32.mrf.mxu3 }
 0xdba   :  { %v1068_v22 = vpop.f32.mrf.mxu3 }
 0xdc2   :  { %v1071_v57 = vpop.f32.mrf.mxu3 }
 0xe16   :  { %v807_v13 = vpop.permute.xlu0 %806 }
 0xe17   :  { %v809_v14 = vmul.f32 %v807_v13, %v802_v9  ;;  %v1085_v13 = vperm.slane %v1083_v0, 0 }
 0xe19   :  { %811 = vrot.lane.b32.xlu1 %v809_v14, %s2100_s24  ;;  %v1086_v14 = vperm.slane %v1083_v0, 1 }
 0xe8b   :  { %v812_v28 = vpop.permute.xlu1 %811 }
 0xe8c   :  { %v814_v20 = vadd.f32 %v812_v28, %v804_v33 }
 0xe8e   :  { %1888 = vtanh.f32 %v814_v20 }
 0xe94   :  { %v1889_v23 = vpop.eup %1888 }
 0xe95   :  { %817 = vrot.lane.b32.xlu2 %v1889_v23, %s2100_s24 }
 0xeef   :  { %v818_v11 = vpop.permute.xlu2 %817 }
 0xef0   :  { %v820_v12 = vmul.f32 %v818_v11, %v803_v10 }
 0xef2   :  { %821 = vst.msk [vmem:[#allocation2 + $0x38] sm:$0xff] %vm262_vm1, %v820_v12 }
 0xef3   :  { %822 = vst.msk [vmem:[#allocation3] sm:$0xff] %vm262_vm1, %v820_v12 }
 0xef9   :  { %v830_v18 = vld [vmem:[#allocation2 + $0x38] sm:$0xff] }
 0xefa   :  { %v847_v21 = vld [vmem:[#allocation3] sm:$0xff]  ;;  %1806 = vmatmul.msk.f32.gmra.mxu2 %vm262_vm1, %v830_v18  ;;  %1814 = vmatmul.msk.f32.gmra.mxu3 %vm262_vm1, %v830_v18 }
 0xefb   :  { %1783 = vmatmul.msk.f32.vlgmr.msrb.gmra.mxu0 %vm262_vm1, %v847_v21  ;;  %1791 = vmatmul.msk.f32.vlgmr.msrb.gmra.mxu1 %vm262_vm1, %v847_v21  ;;  %v1074_v21 = vpop.f32.mrf.mxu3 }
 0xefc   :  { %1286 = vmatpush.msrb.mxu1 %v2484_v62  ;;  %1266 = vmatpush.msrb.mxu0 %v2520_v34 }
 0xefe   :  { %1287 = vmatpush.msrb.mxu1 %v2488_v63  ;;  %1267 = vmatpush.msrb.mxu0 %v2522_v35 }
 0xf00   :  { %1288 = vmatpush.msrb.mxu1 %v2492_v4  ;;  %1268 = vmatpush.msrb.mxu0 %v2526_v36 }
 0xf02   :  { %1289 = vmatpush.msrb.mxu1 %v2498_v15  ;;  %1269 = vmatpush.msrb.mxu0 %v2531_v37 }
 0xf03   :  { %1784 = vmatmul.msk.f32.gmra.mxu0 %vm262_vm1, %v848_v29  ;;  %1792 = vmatmul.msk.f32.gmra.mxu1 %vm262_vm1, %v848_v29 }
 0xf04   :  { %1290 = vmatpush.msrb.mxu1 %v2506_v26  ;;  %1270 = vmatpush.msrb.mxu0 %v2541_v40 }
 0xf06   :  { %1291 = vmatpush.msrb.mxu1 %v2512_v30  ;;  %1271 = vmatpush.msrb.mxu0 %v2543_v41 }
 0xf08   :  { %1292 = vmatpush.msrb.mxu1 %v2518_v32  ;;  %1272 = vmatpush.msrb.mxu0 %v2547_v42 }
 0xf0a   :  { %1293 = vmatpush.msrb.mxu1 %v2539_v39  ;;  %1273 = vmatpush.msrb.mxu0 %v2553_v43 }
 0xf0b   :  { %1785 = vmatmul.msk.f32.gmra.mxu0 %vm262_vm1, %v849_v31  ;;  %1793 = vmatmul.msk.f32.gmra.mxu1 %vm262_vm1, %v849_v31 }
 0xf13   :  { %1786 = vmatmul.msk.f32.gmra.mxu0 %vm262_vm1, %v850_v38  ;;  %1794 = vmatmul.msk.f32.gmra.mxu1 %vm262_vm1, %v850_v38 }
 0xf1b   :  { %1787 = vmatmul.msk.f32.gmra.mxu0 %vm262_vm1, %v851_v44  ;;  %1795 = vmatmul.msk.f32.gmra.mxu1 %vm262_vm1, %v851_v44 }
 0xf23   :  { %1788 = vmatmul.msk.f32.gmra.mxu0 %vm262_vm1, %v852_v45  ;;  %1796 = vmatmul.msk.f32.gmra.mxu1 %vm262_vm1, %v852_v45 }
 0xf2b   :  { %1789 = vmatmul.msk.f32.gmra.mxu0 %vm262_vm1, %v853_v46  ;;  %1797 = vmatmul.msk.f32.gmra.mxu1 %vm262_vm1, %v853_v46 }
 0xf33   :  { %1790 = vmatmul.msk.f32.gmra.mxu0 %vm262_vm1, %v854_v47  ;;  %1798 = vmatmul.msk.f32.gmra.mxu1 %vm262_vm1, %v854_v47 }
 0xf3b   :  { %1137 = vmatmul.f32.vlgmr.msra.gmra.mxu0 %v2099_v24  ;;  %1157 = vmatmul.f32.vlgmr.msra.gmra.mxu1 %v2099_v24  ;;  %v2618_v24 = vpop.f32.mrf.mxu2 }
 0xf3c   :  { %1404 = vmatpush.msra.mxu0 %v2520_v34  ;;  %1424 = vmatpush.msra.mxu1 %v2484_v62 }
 0xf3e   :  { %1405 = vmatpush.msra.mxu0 %v2522_v35  ;;  %1425 = vmatpush.msra.mxu1 %v2488_v63 }
 0xf40   :  { %1406 = vmatpush.msra.mxu0 %v2526_v36  ;;  %1426 = vmatpush.msra.mxu1 %v2492_v4 }
 0xf42   :  { %1407 = vmatpush.msra.mxu0 %v2531_v37  ;;  %1427 = vmatpush.msra.mxu1 %v2498_v15 }
 0xf43   :  { %v1021_v49 = vpop.f32.mrf.mxu2 }
 0xf44   :  { %1408 = vmatpush.msra.mxu0 %v2541_v40  ;;  %1428 = vmatpush.msra.mxu1 %v2506_v26 }
 0xf46   :  { %1409 = vmatpush.msra.mxu0 %v2543_v41  ;;  %1429 = vmatpush.msra.mxu1 %v2512_v30 }
 0xf48   :  { %1410 = vmatpush.msra.mxu0 %v2547_v42  ;;  %1430 = vmatpush.msra.mxu1 %v2518_v32 }
 0xf4a   :  { %1411 = vmatpush.msra.mxu0 %v2553_v43  ;;  %1431 = vmatpush.msra.mxu1 %v2539_v39 }
 0xf4b   :  { %v1024_v1 = vpop.f32.mrf.mxu2 }
 0xf53   :  { %v1027_v19 = vpop.f32.mrf.mxu2 }
 0xf5b   :  { %v1030_v56 = vpop.f32.mrf.mxu2 }
 0xf63   :  { %v1033_v18 = vpop.f32.mrf.mxu2 }
 0xf6b   :  { %v1036_v47 = vpop.f32.mrf.mxu2 }
 0xf78   :  { %v2620_v51 = vpop.f32.mrf.mxu0  ;;  %v953_v52 = vpop.f32.mrf.mxu1 }
 0xf80   :  { %v915_v5 = vpop.f32.mrf.mxu0  ;;  %v956_v7 = vpop.f32.mrf.mxu1 }
 0xf81   :  { %v1022_v8 = vadd.f32 %v1021_v49, %v915_v5  ;;  %v1063_v9 = vadd.f32 %v1062_v50, %v956_v7  ;;  %v1077_v49 = vpop.f32.mrf.mxu3 }
 0xf83   :  { %v2625_v27 = vadd.f32 %v1085_v13, %v1022_v8  ;;  %v2627_v6 = vadd.f32 %v1086_v14, %v1063_v9  ;;  %v1039_v8 = vpop.f32.mrf.mxu2 }
 0xf88   :  { %v918_v16 = vpop.f32.mrf.mxu0  ;;  %v959_v17 = vpop.f32.mrf.mxu1 }
 0xf89   :  { %v1025_v33 = vadd.f32 %v1024_v1, %v918_v16  ;;  %v1066_v28 = vadd.f32 %v1065_v2, %v959_v17  ;;  %v1080_v9 = vpop.f32.mrf.mxu3 }
 0xf8b   :  { %v2629_v20 = vadd.f32 %v1085_v13, %v1025_v33  ;;  %v2631_v23 = vadd.f32 %v1086_v14, %v1066_v28  ;;  %v1060_v33 = vadd.f32 %v1059_v48, %v953_v52 }
 0xf90   :  { %v921_v25 = vpop.f32.mrf.mxu0  ;;  %v962_v53 = vpop.f32.mrf.mxu1 }
 0xf91   :  { %v1028_v54 = vadd.f32 %v1027_v19, %v921_v25  ;;  %v1069_v55 = vadd.f32 %v1068_v22, %v962_v53  ;;  %v1090_v53 = vadd.f32 %v1086_v14, %v1060_v33 }
 0xf93   :  { %v2633_v58 = vadd.f32 %v1085_v13, %v1028_v54  ;;  %v2635_v59 = vadd.f32 %v1086_v14, %v1069_v55 }
 0xf98   :  { %v924_v60 = vpop.f32.mrf.mxu0  ;;  %v965_v61 = vpop.f32.mrf.mxu1 }
 0xf99   :  { %v1031_v3 = vadd.f32 %v1030_v56, %v924_v60  ;;  %v1072_v10 = vadd.f32 %v1071_v57, %v965_v61  ;;  %v1019_v57 = vadd.f32 %v2618_v24, %v2620_v51 }
 0xf9b   :  { %v2637_v11 = vadd.f32 %v1085_v13, %v1031_v3  ;;  %v2639_v12 = vadd.f32 %v1086_v14, %v1072_v10  ;;  %v1089_v61 = vadd.f32 %v1085_v13, %v1019_v57 }
 0xfa0   :  { %v927_v29 = vpop.f32.mrf.mxu0  ;;  %v968_v31 = vpop.f32.mrf.mxu1 }
 0xfa1   :  { %v1034_v38 = vadd.f32 %v1033_v18, %v927_v29  ;;  %v1075_v44 = vadd.f32 %v1074_v21, %v968_v31 }
 0xfa3   :  { %v2641_v45 = vadd.f32 %v1085_v13, %v1034_v38  ;;  %v2643_v46 = vadd.f32 %v1086_v14, %v1075_v44 }
 0xfa8   :  { %v930_v50 = vpop.f32.mrf.mxu0  ;;  %v971_v0 = vpop.f32.mrf.mxu1 }
 0xfa9   :  { %v1037_v1 = vadd.f32 %v1036_v47, %v930_v50  ;;  %v1078_v2 = vadd.f32 %v1077_v49, %v971_v0 }
 0xfab   :  { %v2645_v5 = vadd.f32 %v1085_v13, %v1037_v1  ;;  %v2647_v7 = vadd.f32 %v1086_v14, %v1078_v2 }
 0xfb0   :  { %v933_v16 = vpop.f32.mrf.mxu0  ;;  %v974_v17 = vpop.f32.mrf.mxu1 }
 0xfb1   :  { %v1040_v19 = vadd.f32 %v1039_v8, %v933_v16  ;;  %v1081_v22 = vadd.f32 %v1080_v9, %v974_v17 }
 0xfb3   :  { %v2649_v28 = vadd.f32 %v1085_v13, %v1040_v19  ;;  %v2651_v25 = vadd.f32 %v1086_v14, %v1081_v22 }
 0xfb8   :  { %v1158_v54 = vpop.f32.mrf.mxu1  ;;  %v1138_v60 = vpop.f32.mrf.mxu0 }
 0xfb9   :  { %v1162_v55 = vadd.f32 %v1158_v54, %v1090_v53  ;;  %v1161_v3 = vadd.f32 %v1138_v60, %v1089_v61 }
 0xfbb   :  { %1890 = vtanh.f32 %v1162_v55 }
 0xfbc   :  { %1892 = vtanh.f32 %v1161_v3 }
 0xfc1   :  { %v1891_v56 = vpop.eup %1890 }
 0xfc2   :  { %1171 = vrot.lane.b32.xlu0 %v1891_v56, %s2100_s24  ;;  %v1893_v10 = vpop.eup %1892  ;;  %v1166_v44 = vmul.f32 0.5, %v1891_v56 }
 0xfc3   :  { %v1165_v48 = vmul.f32 0.5, %v1893_v10 }
 0xfc4   :  { %v1168_v24 = vadd.f32 0.5, %v1166_v44 }
 0xfc5   :  { %v1167_v52 = vadd.f32 0.5, %v1165_v48 }
 0xfc7   :  { %v1169_v14 = vmul.f32 0.0, %v1167_v52 }
0x1034   :  { %v1172_v18 = vpop.permute.xlu0 %1171 }
0x1035   :  { %v1174_v21 = vmul.f32 %v1172_v18, %v1167_v52 }
0x1037   :  { %1176 = vrot.lane.b32.xlu1 %v1174_v21, %s2100_s24 }
0x10a9   :  { %v1177_v29 = vpop.permute.xlu1 %1176 }
0x10aa   :  { %v1179_v31 = vadd.f32 %v1177_v29, %v1169_v14 }
0x10ac   :  { %1894 = vtanh.f32 %v1179_v31 }
0x10b2   :  { %v1895_v38 = vpop.eup %1894 }
0x10b3   :  { %1182 = vrot.lane.b32.xlu2 %v1895_v38, %s2100_s24 }
0x110d   :  { %v1183_v51 = vpop.permute.xlu2 %1182 }
0x110e   :  { %v2658_v13 = vmul.f32 %v1183_v51, %v1168_v24 }
0x1110   :  { %1815 = vmatmul.msk.f32.vlgmr.msrb.gmra.mxu2 %vm262_vm1, %v2658_v13  ;;  %1816 = vmatmul.msk.f32.vlgmr.msrb.gmra.mxu3 %vm262_vm1, %v2658_v13 }
0x1111   :  { %1473 = vmatpush.msrb.mxu2 %v2520_v34  ;;  %1493 = vmatpush.msrb.mxu3 %v2484_v62 }
0x1113   :  { %1474 = vmatpush.msrb.mxu2 %v2522_v35  ;;  %1494 = vmatpush.msrb.mxu3 %v2488_v63 }
0x1115   :  { %1475 = vmatpush.msrb.mxu2 %v2526_v36  ;;  %1495 = vmatpush.msrb.mxu3 %v2492_v4 }
0x1117   :  { %1476 = vmatpush.msrb.mxu2 %v2531_v37  ;;  %1496 = vmatpush.msrb.mxu3 %v2498_v15 }
0x1119   :  { %1477 = vmatpush.msrb.mxu2 %v2541_v40  ;;  %1497 = vmatpush.msrb.mxu3 %v2506_v26 }
0x111b   :  { %1478 = vmatpush.msrb.mxu2 %v2543_v41  ;;  %1498 = vmatpush.msrb.mxu3 %v2512_v30 }
0x111d   :  { %1479 = vmatpush.msrb.mxu2 %v2547_v42  ;;  %1499 = vmatpush.msrb.mxu3 %v2518_v32 }
0x111f   :  { %1480 = vmatpush.msrb.mxu2 %v2553_v43  ;;  %1500 = vmatpush.msrb.mxu3 %v2539_v39 }
0x1193   :  { %v1226_v47 = vpop.f32.mrf.mxu3  ;;  %v1206_v0 = vpop.f32.mrf.mxu2 }
0x1194   :  { %v1230_v49 = vadd.f32 %v1226_v47, %v2627_v6  ;;  %v1229_v1 = vadd.f32 %v1206_v0, %v2625_v27 }
0x1196   :  { %1896 = vtanh.f32 %v1230_v49 }
0x1197   :  { %1898 = vtanh.f32 %v1229_v1 }
0x119c   :  { %v1897_v50 = vpop.eup %1896 }
0x119d   :  { %1239 = vrot.lane.b32.xlu0 %v1897_v50, %s2100_s24  ;;  %v1899_v2 = vpop.eup %1898  ;;  %v1234_v53 = vmul.f32 0.5, %v1897_v50 }
0x119e   :  { %v1233_v8 = vmul.f32 0.5, %v1899_v2 }
0x119f   :  { %v1236_v54 = vadd.f32 0.5, %v1234_v53 }
0x11a0   :  { %v1235_v9 = vadd.f32 0.5, %v1233_v8 }
0x11a2   :  { %v1237_v19 = vmul.f32 %v1235_v9, %v1179_v31 }
0x120f   :  { %v1240_v16 = vpop.permute.xlu0 %1239 }
0x1210   :  { %v1242_v17 = vmul.f32 %v1240_v16, %v1235_v9 }
0x1212   :  { %1244 = vrot.lane.b32.xlu1 %v1242_v17, %s2100_s24 }
0x1284   :  { %v1245_v22 = vpop.permute.xlu1 %1244 }
0x1285   :  { %v1247_v33 = vadd.f32 %v1245_v22, %v1237_v19 }
0x1287   :  { %1900 = vtanh.f32 %v1247_v33 }
0x128d   :  { %v1901_v6 = vpop.eup %1900 }
0x128e   :  { %1250 = vrot.lane.b32.xlu2 %v1901_v6, %s2100_s24 }
0x12e8   :  { %v1251_v55 = vpop.permute.xlu2 %1250 }
0x12e9   :  { %v1253_v56 = vmul.f32 %v1251_v55, %v1236_v54 }
0x12eb   :  { %1817 = vmatmul.msk.f32.vlgmr.msrb.gmra.mxu0 %vm262_vm1, %v1253_v56  ;;  %1818 = vmatmul.msk.f32.vlgmr.msrb.gmra.mxu1 %vm262_vm1, %v1253_v56 }
0x12ec   :  { %1542 = vmatpush.msrb.mxu0 %v2520_v34  ;;  %1562 = vmatpush.msrb.mxu1 %v2484_v62 }
0x12ee   :  { %1543 = vmatpush.msrb.mxu0 %v2522_v35  ;;  %1563 = vmatpush.msrb.mxu1 %v2488_v63 }
0x12f0   :  { %1544 = vmatpush.msrb.mxu0 %v2526_v36  ;;  %1564 = vmatpush.msrb.mxu1 %v2492_v4 }
0x12f2   :  { %1545 = vmatpush.msrb.mxu0 %v2531_v37  ;;  %1565 = vmatpush.msrb.mxu1 %v2498_v15 }
0x12f4   :  { %1546 = vmatpush.msrb.mxu0 %v2541_v40  ;;  %1566 = vmatpush.msrb.mxu1 %v2506_v26 }
0x12f6   :  { %1547 = vmatpush.msrb.mxu0 %v2543_v41  ;;  %1567 = vmatpush.msrb.mxu1 %v2512_v30 }
0x12f8   :  { %1548 = vmatpush.msrb.mxu0 %v2547_v42  ;;  %1568 = vmatpush.msrb.mxu1 %v2518_v32 }
0x12fa   :  { %1549 = vmatpush.msrb.mxu0 %v2553_v43  ;;  %1569 = vmatpush.msrb.mxu1 %v2539_v39 }
0x1368   :  { %v1295_v27 = vpop.f32.mrf.mxu1  ;;  %v1275_v61 = vpop.f32.mrf.mxu0 }
0x1369   :  { %v1299_v57 = vadd.f32 %v1295_v27, %v2631_v23  ;;  %v1298_v3 = vadd.f32 %v1275_v61, %v2629_v20  ;;  %v1254_v20 = vmax.f32 %v2658_v13, %v1253_v56 }
0x136b   :  { %1902 = vtanh.f32 %v1299_v57 }
0x136c   :  { %1904 = vtanh.f32 %v1298_v3 }
0x1371   :  { %v1903_v60 = vpop.eup %1902 }
0x1372   :  { %1308 = vrot.lane.b32.xlu0 %v1903_v60, %s2100_s24  ;;  %v1905_v10 = vpop.eup %1904  ;;  %v1303_v38 = vmul.f32 0.5, %v1903_v60 }
0x1373   :  { %v1302_v48 = vmul.f32 0.5, %v1905_v10 }
0x1374   :  { %v1305_v44 = vadd.f32 0.5, %v1303_v38 }
0x1375   :  { %v1304_v52 = vadd.f32 0.5, %v1302_v48 }
0x1377   :  { %v1306_v14 = vmul.f32 %v1304_v52, %v1247_v33 }
0x13e4   :  { %v1309_v18 = vpop.permute.xlu0 %1308 }
0x13e5   :  { %v1311_v21 = vmul.f32 %v1309_v18, %v1304_v52 }
0x13e7   :  { %1313 = vrot.lane.b32.xlu1 %v1311_v21, %s2100_s24 }
0x1459   :  { %v1314_v29 = vpop.permute.xlu1 %1313 }
0x145a   :  { %v1316_v31 = vadd.f32 %v1314_v29, %v1306_v14 }
0x145c   :  { %1906 = vtanh.f32 %v1316_v31 }
0x1462   :  { %v1907_v23 = vpop.eup %1906 }
0x1463   :  { %1319 = vrot.lane.b32.xlu2 %v1907_v23, %s2100_s24 }
0x14bd   :  { %v1320_v24 = vpop.permute.xlu2 %1319 }
0x14be   :  { %v1322_v51 = vmul.f32 %v1320_v24, %v1305_v44 }
0x14c0   :  { %v2709_v47 = vmax.f32 %v1254_v20, %v1322_v51  ;;  %1819 = vmatmul.msk.f32.vlgmr.msra.gmra.mxu2 %vm262_vm1, %v1322_v51  ;;  %1820 = vmatmul.msk.f32.vlgmr.msra.gmra.mxu3 %vm262_vm1, %v1322_v51 }
0x14c1   :  { %1611 = vmatpush.msra.mxu2 %v2520_v34  ;;  %1631 = vmatpush.msra.mxu3 %v2484_v62 }
0x14c3   :  { %1612 = vmatpush.msra.mxu2 %v2522_v35  ;;  %1632 = vmatpush.msra.mxu3 %v2488_v63 }
0x14c5   :  { %1613 = vmatpush.msra.mxu2 %v2526_v36  ;;  %1633 = vmatpush.msra.mxu3 %v2492_v4 }
0x14c7   :  { %1614 = vmatpush.msra.mxu2 %v2531_v37  ;;  %1634 = vmatpush.msra.mxu3 %v2498_v15 }
0x14c9   :  { %1615 = vmatpush.msra.mxu2 %v2541_v40  ;;  %1635 = vmatpush.msra.mxu3 %v2506_v26 }
0x14cb   :  { %1616 = vmatpush.msra.mxu2 %v2543_v41  ;;  %1636 = vmatpush.msra.mxu3 %v2512_v30 }
0x14cd   :  { %1617 = vmatpush.msra.mxu2 %v2547_v42  ;;  %1637 = vmatpush.msra.mxu3 %v2518_v32 }
0x14cf   :  { %1618 = vmatpush.msra.mxu2 %v2553_v43  ;;  %1638 = vmatpush.msra.mxu3 %v2539_v39 }
0x1543   :  { %v1364_v62 = vpop.f32.mrf.mxu3  ;;  %v1344_v15 = vpop.f32.mrf.mxu2 }
0x1544   :  { %v1368_v63 = vadd.f32 %v1364_v62, %v2635_v59  ;;  %v1367_v26 = vadd.f32 %v1344_v15, %v2633_v58 }
0x1546   :  { %1908 = vtanh.f32 %v1368_v63 }
0x1547   :  { %1910 = vtanh.f32 %v1367_v26 }
0x154c   :  { %v1909_v4 = vpop.eup %1908 }
0x154d   :  { %1377 = vrot.lane.b32.xlu0 %v1909_v4, %s2100_s24  ;;  %v1911_v30 = vpop.eup %1910  ;;  %v1372_v42 = vmul.f32 0.5, %v1909_v4 }
0x154e   :  { %v1371_v34 = vmul.f32 0.5, %v1911_v30 }
0x154f   :  { %v1374_v43 = vadd.f32 0.5, %v1372_v42 }
0x1550   :  { %v1373_v35 = vadd.f32 0.5, %v1371_v34 }
0x1552   :  { %v1375_v37 = vmul.f32 %v1373_v35, %v1316_v31 }
0x15bf   :  { %v1378_v36 = vpop.permute.xlu0 %1377 }
0x15c0   :  { %v1380_v32 = vmul.f32 %v1378_v36, %v1373_v35 }
0x15c2   :  { %1382 = vrot.lane.b32.xlu1 %v1380_v32, %s2100_s24 }
0x1634   :  { %v1383_v39 = vpop.permute.xlu1 %1382 }
0x1635   :  { %v1385_v40 = vadd.f32 %v1383_v39, %v1375_v37 }
0x1637   :  { %1912 = vtanh.f32 %v1385_v40 }
0x163d   :  { %v1913_v41 = vpop.eup %1912 }
0x163e   :  { %1388 = vrot.lane.b32.xlu2 %v1913_v41, %s2100_s24 }
0x1698   :  { %v1389_v59 = vpop.permute.xlu2 %1388 }
0x1699   :  { %v1391_v13 = vmul.f32 %v1389_v59, %v1374_v43 }
0x169b   :  { %v1392_v58 = vmax.f32 %v2709_v47, %v1391_v13  ;;  %1821 = vmatmul.msk.f32.vlgmr.msra.gmra.mxu0 %vm262_vm1, %v1391_v13  ;;  %1822 = vmatmul.msk.f32.vlgmr.msra.gmra.mxu1 %vm262_vm1, %v1391_v13 }
0x1718   :  { %v1433_v49 = vpop.f32.mrf.mxu1  ;;  %v1413_v1 = vpop.f32.mrf.mxu0 }
0x1719   :  { %v1437_v50 = vadd.f32 %v1433_v49, %v2639_v12  ;;  %v1436_v2 = vadd.f32 %v1413_v1, %v2637_v11 }
0x171b   :  { %1914 = vtanh.f32 %v1437_v50 }
0x171c   :  { %1916 = vtanh.f32 %v1436_v2 }
0x1721   :  { %v1915_v0 = vpop.eup %1914 }
0x1722   :  { %1446 = vrot.lane.b32.xlu0 %v1915_v0, %s2100_s24  ;;  %v1917_v8 = vpop.eup %1916  ;;  %v1441_v53 = vmul.f32 0.5, %v1915_v0 }
0x1723   :  { %v1440_v9 = vmul.f32 0.5, %v1917_v8  ;;  %v1679_v8 = vld [vmem:[%s2812_s9 + $0x48] sm:$0xff] }
0x1724   :  { %v1443_v54 = vadd.f32 0.5, %v1441_v53  ;;  %1692 = vmatpush.msra.mxu0 %v1679_v8  ;;  %v1670_v53 = vld [vmem:[%s2812_s9] sm:$0xff] }
0x1725   :  { %v1442_v16 = vadd.f32 0.5, %v1440_v9 }
0x1727   :  { %v1444_v22 = vmul.f32 %v1442_v16, %v1385_v40 }
0x1794   :  { %v1447_v17 = vpop.permute.xlu0 %1446 }
0x1795   :  { %v1449_v19 = vmul.f32 %v1447_v17, %v1442_v16 }
0x1797   :  { %1451 = vrot.lane.b32.xlu1 %v1449_v19, %s2100_s24  ;;  %v1677_v19 = vld [vmem:[%s2812_s9 + $0x38] sm:$0xff] }
0x1809   :  { %v1452_v33 = vpop.permute.xlu1 %1451 }
0x180a   :  { %v1454_v6 = vadd.f32 %v1452_v33, %v1444_v22  ;;  %v1676_v22 = vld [vmem:[%s2812_s9 + $0x30] sm:$0xff]  ;;  %v1675_v33 = vld [vmem:[%s2812_s9 + $0x28] sm:$0xff] }
0x180c   :  { %1918 = vtanh.f32 %v1454_v6 }
0x1812   :  { %v1919_v12 = vpop.eup %1918 }
0x1813   :  { %1457 = vrot.lane.b32.xlu2 %v1919_v12, %s2100_s24  ;;  %v1674_v12 = vld [vmem:[%s2812_s9 + $0x20] sm:$0xff] }
0x186d   :  { %v1458_v55 = vpop.permute.xlu2 %1457 }
0x186e   :  { %v1460_v56 = vmul.f32 %v1458_v55, %v1443_v54  ;;  %v1673_v54 = vld [vmem:[%s2812_s9 + $0x18] sm:$0xff]  ;;  %v1672_v55 = vld [vmem:[%s2812_s9 + $0x10] sm:$0xff] }
0x1870   :  { %v1461_v11 = vmax.f32 %v1392_v58, %v1460_v56  ;;  %1823 = vmatmul.msk.f32.vlgmr.msrb.gmra.mxu2 %vm262_vm1, %v1460_v56  ;;  %1824 = vmatmul.msk.f32.vlgmr.msrb.gmra.mxu3 %vm262_vm1, %v1460_v56  ;;  %v1680_v56 = vld [vmem:[%s2811_s8] sm:$0xff] }
0x18f3   :  { %v1502_v27 = vpop.f32.mrf.mxu3  ;;  %v1482_v61 = vpop.f32.mrf.mxu2 }
0x18f4   :  { %v1506_v57 = vadd.f32 %v1502_v27, %v2643_v46  ;;  %v1505_v3 = vadd.f32 %v1482_v61, %v2641_v45 }
0x18f6   :  { %1920 = vtanh.f32 %v1506_v57 }
0x18f7   :  { %1922 = vtanh.f32 %v1505_v3 }
0x18fc   :  { %v1921_v60 = vpop.eup %1920 }
0x18fd   :  { %1515 = vrot.lane.b32.xlu0 %v1921_v60, %s2100_s24  ;;  %v1923_v10 = vpop.eup %1922  ;;  %v1510_v23 = vmul.f32 0.5, %v1921_v60 }
0x18fe   :  { %v1509_v48 = vmul.f32 0.5, %v1923_v10 }
0x18ff   :  { %v1512_v38 = vadd.f32 0.5, %v1510_v23 }
0x1900   :  { %v1511_v52 = vadd.f32 0.5, %v1509_v48  ;;  %v1841_v48 = vld [vmem:[%s2813_s10] ss:$0 sm:$0xff] }
0x1902   :  { %v1513_v14 = vmul.f32 %v1511_v52, %v1454_v6  ;;  %v1671_v6 = vld [vmem:[%s2812_s9 + $0x8] sm:$0xff] }
0x1903   :  { %1722 = vmatpush.msra.mxu1 %v1671_v6 }
0x1905   :  { %1723 = vmatpush.msra.mxu1 %v1670_v53 }
0x196f   :  { %v1516_v18 = vpop.permute.xlu0 %1515 }
0x1970   :  { %v1518_v21 = vmul.f32 %v1516_v18, %v1511_v52 }
0x1972   :  { %1520 = vrot.lane.b32.xlu1 %v1518_v21, %s2100_s24 }
0x19e4   :  { %v1521_v29 = vpop.permute.xlu1 %1520 }
0x19e5   :  { %v1523_v31 = vadd.f32 %v1521_v29, %v1513_v14 }
0x19e7   :  { %1924 = vtanh.f32 %v1523_v31 }
0x19ed   :  { %v1925_v46 = vpop.eup %1924 }
0x19ee   :  { %1526 = vrot.lane.b32.xlu2 %v1925_v46, %s2100_s24 }
0x1a48   :  { %v1527_v44 = vpop.permute.xlu2 %1526 }
0x1a49   :  { %v1529_v24 = vmul.f32 %v1527_v44, %v1512_v38 }
0x1a4b   :  { %v1530_v45 = vmax.f32 %v1461_v11, %v1529_v24  ;;  %1825 = vmatmul.msk.f32.vlgmr.msrb.gmra.mxu0 %vm262_vm1, %v1529_v24  ;;  %1826 = vmatmul.msk.f32.vlgmr.msrb.gmra.mxu1 %vm262_vm1, %v1529_v24 }
0x1a53   :  { %1830 = vmatmul.msk.f32.vlgmr.msra.gmra.mxu1 %vm1704_vm2, %v1680_v56 }
0x1ac8   :  { %v1571_v20 = vpop.f32.mrf.mxu1  ;;  %v1551_v62 = vpop.f32.mrf.mxu0 }
0x1ac9   :  { %v1575_v51 = vadd.f32 %v1571_v20, %v2647_v7  ;;  %v1574_v63 = vadd.f32 %v1551_v62, %v2645_v5 }
0x1acb   :  { %1926 = vtanh.f32 %v1575_v51 }
0x1acc   :  { %1928 = vtanh.f32 %v1574_v63 }
0x1ad0   :  { %v1725_v10 = vpop.f32.mrf.mxu1 }
0x1ad1   :  { %v1927_v47 = vpop.eup %1926 }
0x1ad2   :  { %1584 = vrot.lane.b32.xlu0 %v1927_v47, %s2100_s24  ;;  %v1929_v4 = vpop.eup %1928  ;;  %v1579_v37 = vmul.f32 0.5, %v1927_v47 }
0x1ad3   :  { %v1578_v15 = vmul.f32 0.5, %v1929_v4 }
0x1ad4   :  { %v1581_v39 = vadd.f32 0.5, %v1579_v37 }
0x1ad5   :  { %v1580_v26 = vadd.f32 0.5, %v1578_v15 }
0x1ad7   :  { %v1582_v35 = vmul.f32 %v1580_v26, %v1523_v31 }
0x1b44   :  { %v1585_v30 = vpop.permute.xlu0 %1584 }
0x1b45   :  { %v1587_v34 = vmul.f32 %v1585_v30, %v1580_v26 }
0x1b47   :  { %1589 = vrot.lane.b32.xlu1 %v1587_v34, %s2100_s24 }
0x1bb9   :  { %v1590_v36 = vpop.permute.xlu1 %1589 }
0x1bba   :  { %v1592_v32 = vadd.f32 %v1590_v36, %v1582_v35 }
0x1bbc   :  { %1930 = vtanh.f32 %v1592_v32 }
0x1bc2   :  { %v1931_v7 = vpop.eup %1930 }
0x1bc3   :  { %1595 = vrot.lane.b32.xlu2 %v1931_v7, %s2100_s24 }
0x1c1d   :  { %v1596_v40 = vpop.permute.xlu2 %1595 }
0x1c1e   :  { %v1598_v41 = vmul.f32 %v1596_v40, %v1581_v39 }
0x1c20   :  { %1827 = vmatmul.msk.f32.vlgmr.msra.gmra.mxu2 %vm262_vm1, %v1598_v41  ;;  %1828 = vmatmul.msk.f32.vlgmr.msra.gmra.mxu3 %vm262_vm1, %v1598_v41  ;;  %v1599_v5 = vmax.f32 %v1530_v45, %v1598_v41 }
0x1ca3   :  { %v1640_v42 = vpop.f32.mrf.mxu3  ;;  %v1620_v13 = vpop.f32.mrf.mxu2 }
0x1ca4   :  { %v1644_v43 = vadd.f32 %v1640_v42, %v2651_v25  ;;  %v1643_v58 = vadd.f32 %v1620_v13, %v2649_v28  ;;  %v1678_v25 = vld [vmem:[%s2812_s9 + $0x40] sm:$0xff] }
0x1ca5   :  { %1693 = vmatpush.msra.mxu0 %v1678_v25 }
0x1ca6   :  { %1932 = vtanh.f32 %v1644_v43 }
0x1ca7   :  { %1934 = vtanh.f32 %v1643_v58  ;;  %1694 = vmatpush.msra.mxu0 %v1677_v19 }
0x1ca9   :  { %1695 = vmatpush.msra.mxu0 %v1676_v22 }
0x1cab   :  { %1696 = vmatpush.msra.mxu0 %v1675_v33 }
0x1cac   :  { %v1933_v59 = vpop.eup %1932 }
0x1cad   :  { %1653 = vrot.lane.b32.xlu0 %v1933_v59, %s2100_s24  ;;  %v1935_v49 = vpop.eup %1934  ;;  %1697 = vmatpush.msra.mxu0 %v1674_v12  ;;  %v1648_v11 = vmul.f32 0.5, %v1933_v59 }
0x1cae   :  { %v1647_v50 = vmul.f32 0.5, %v1935_v49 }
0x1caf   :  { %1698 = vmatpush.msra.mxu0 %v1673_v54  ;;  %v1650_v27 = vadd.f32 0.5, %v1648_v11 }
0x1cb0   :  { %v1649_v0 = vadd.f32 0.5, %v1647_v50 }
0x1cb1   :  { %1699 = vmatpush.msra.mxu0 %v1672_v55 }
0x1cb2   :  { %v1651_v9 = vmul.f32 %v1649_v0, %v1592_v32 }
0x1d1f   :  { %v1654_v1 = vpop.permute.xlu0 %1653 }
0x1d20   :  { %v1656_v2 = vmul.f32 %v1654_v1, %v1649_v0 }
0x1d22   :  { %1658 = vrot.lane.b32.xlu1 %v1656_v2, %s2100_s24 }
0x1d94   :  { %v1659_v28 = vpop.permute.xlu1 %1658 }
0x1d95   :  { %v1661_v16 = vadd.f32 %v1659_v28, %v1651_v9 }
0x1d97   :  { %1936 = vtanh.f32 %v1661_v16 }
0x1d9d   :  { %v1937_v17 = vpop.eup %1936 }
0x1d9e   :  { %1664 = vrot.lane.b32.xlu2 %v1937_v17, %s2100_s24 }
0x1df8   :  { %v1665_v57 = vpop.permute.xlu2 %1664 }
0x1df9   :  { %v1667_v60 = vmul.f32 %v1665_v57, %v1650_v27 }
0x1dfb   :  { %v1668_v61 = vmax.f32 %v1599_v5, %v1667_v60 }
0x1dfd   :  { %1938 = vtanh.f32 %v1668_v61 }
0x1e03   :  { %v1939_v3 = vpop.eup %1938 }
0x1e04   :  { %1829 = vmatmul.msk.f32.vlgmr.msra.gmra.mxu0 %vm262_vm1, %v1939_v3 }
0x1e81   :  { %v1701_v52 = vpop.f32.mrf.mxu0 }
0x1e82   :  { %v1726_v18 = vadd.f32 %v1725_v10, %v1701_v52 }
0x1e84   :  { %v1732_v21 = vadd.f32 %v1841_v48, %v1726_v18 }
0x1e86   :  { %1733 = vst [vmem:[#allocation13] sm:$0xff] %v1732_v21 }
0x1e87   :  { %1744 = dma.vmem_to_hbm [thread:$0]  %s1740_s5, 128, %s1742_s17, [#allocation6]  }
0x1e88   :  { %2090 = dma.done.wait [#allocation6], 128  }
0x1e89   :  { %2091 = vsyncadd [#allocation6], 4294967168 }
0x1e8a   :  { %1749 = vsyncpa [#allocation5], 1 }
0x1e8b   :  { %1750 = vsyncpa [#allocation8], 1 }
0x1e8c   :  { %1751 = vsyncpa [#allocation11], 1 }
0x1e8d   :  { %1752 = vsyncpa [#allocation6], 1 }

</bundles_post_ra>
